<compile_context>
chip_gen: v6e
topology: v6e:2x2x1
jax: 0.10.0
libtpu: 0.0.40
codegen_flags: <defaults>
</compile_context>

<pallas_src>
import functools
import math

import jax
import jax.numpy as jnp
from jax.experimental import pallas as pl
from jax.experimental.pallas import tpu as pltpu


# --------------------------------------------------------------------------
# VMEM budget: ~3/4 of the chip's VMEM, capped.  Fallback assumes the smallest
# per-core VMEM (v7x: 64 MiB) so an unknown chip never over-commits.
def _vmem_limit_bytes():
    cap = 64 * 1024 * 1024
    try:
        info = pltpu.get_tpu_info()
        cap = int(getattr(info, "vmem_capacity_bytes", cap) or cap)
    except Exception:
        pass
    return int(min(cap * 3 // 4, 100 * 1024 * 1024))


_VMEM_LIMIT = _vmem_limit_bytes()
_LARGE_VMEM = _VMEM_LIMIT >= 96 * 1024 * 1024       # v5e/v6e (128 MiB) vs v7x (64 MiB)

_BLOCK_M = 512 if _LARGE_VMEM else 256              # row tiles
_BLOCK_N_VOCAB = 1024 if _LARGE_VMEM else 512       # vocab output-column tile
_BLOCK_F = 2048 if _LARGE_VMEM else 1024            # dim_feedforward tile
_BLOCK_Q = 256                                      # attention query tile


def _tile(dim, preferred, align):
    """Largest multiple of `align` <= preferred that divides `dim`.

    Falls back to the full dim (legal for Mosaic: block == array extent) when no
    aligned divisor exists; raises instead of silently creating a giant block
    that would blow the VMEM budget."""
    if dim <= preferred:
        return dim
    t = (preferred // align) * align
    while t >= align:
        if dim % t == 0:
            return t
        t -= align
    if dim > 8 * preferred:
        raise ValueError(
            f"dimension {dim} has no {align}-aligned tile <= {preferred}; pad it.")
    return dim


def _compiler_params(dimension_semantics):
    return pltpu.CompilerParams(
        dimension_semantics=dimension_semantics,
        vmem_limit_bytes=_VMEM_LIMIT,
    )


# --------------------------- kernel 1: LN1 + QKV ------------------------------

def _ln_qkv_kernel(x_ref, g_ref, b_ref, wq_ref, bq_ref, wk_ref, bk_ref,
                   wv_ref, bv_ref, q_ref, k_ref, v_ref, *, eps):
    # LayerNorm statistics in f32; matmul operands fed in their native dtype.
    x = x_ref[...].astype(jnp.float32)
    mean = jnp.mean(x, axis=-1, keepdims=True)
    var = jnp.mean(jnp.square(x - mean), axis=-1, keepdims=True)
    xn = (x - mean) * jax.lax.rsqrt(var + eps)
    xn = xn * g_ref[...].astype(jnp.float32) + b_ref[...].astype(jnp.float32)
    xn = xn.astype(x_ref.dtype)
    q_ref[...] = (jnp.dot(xn, wq_ref[...], preferred_element_type=jnp.float32)
                  + bq_ref[...].astype(jnp.float32)).astype(q_ref.dtype)
    k_ref[...] = (jnp.dot(xn, wk_ref[...], preferred_element_type=jnp.float32)
                  + bk_ref[...].astype(jnp.float32)).astype(k_ref.dtype)
    v_ref[...] = (jnp.dot(xn, wv_ref[...], preferred_element_type=jnp.float32)
                  + bv_ref[...].astype(jnp.float32)).astype(v_ref.dtype)


def ln_qkv(x2d, gamma, beta, wq, bq, wk, bk, wv, bv, *, eps=1e-5, block_m=None):
    m, d = x2d.shape
    tm = _tile(m, block_m or _BLOCK_M, 8)
    shp = jax.ShapeDtypeStruct((m, d), x2d.dtype)
    row_spec = pl.BlockSpec((tm, d), lambda i: (i, 0))
    vec_spec = pl.BlockSpec((1, d), lambda i: (0, 0))
    w_spec = pl.BlockSpec((d, d), lambda i: (0, 0))     # weights stay VMEM-resident
    return pl.pallas_call(
        functools.partial(_ln_qkv_kernel, eps=eps),
        out_shape=(shp, shp, shp),
        grid=(m // tm,),
        in_specs=[row_spec, vec_spec, vec_spec,
                  w_spec, vec_spec, w_spec, vec_spec, w_spec, vec_spec],
        out_specs=(row_spec, row_spec, row_spec),
        compiler_params=_compiler_params(("parallel",)),
    )(x2d, gamma.reshape(1, d), beta.reshape(1, d),
      wq, bq.reshape(1, d), wk, bk.reshape(1, d), wv, bv.reshape(1, d))


# --------------------------- kernel 2: attention -----------------------------

def _mha_kernel(q_ref, k_ref, v_ref, o_ref, *, nhead, dh):
    # One (batch, q-tile) grid step: all heads of this query tile against the
    # full K/V of the batch element.  Q was pre-scaled by 1/sqrt(dh) at prepare
    # time.  Per-head results are written straight into the VMEM output block
    # (no concat); the HBM writeback is one lane-dense (tq, D) store.
    # No mask: create_caption_mask() is identically zero for S <= 16*768.
    # TODO(synk): kv-tiled online-softmax path for very long sequences.
    q = q_ref[0]                                   # (tq, D)
    k = k_ref[0]                                   # (S,  D)
    v = v_ref[0]
    for h in range(nhead):
        sl = slice(h * dh, (h + 1) * dh)
        qh, kh, vh = q[:, sl], k[:, sl], v[:, sl]
        # contract last dims directly (A.B^T) — no explicit transpose of K
        s = jax.lax.dot_general(qh, kh, (((1,), (1,)), ((), ())),
                                preferred_element_type=jnp.float32)   # (tq, S)
        s = s - jnp.max(s, axis=-1, keepdims=True)
        p = jnp.exp(s)
        p = p / jnp.sum(p, axis=-1, keepdims=True)     # exact divide (correctness)
        o = jnp.dot(p.astype(vh.dtype), vh, preferred_element_type=jnp.float32)
        o_ref[0, :, sl] = o.astype(o_ref.dtype)


def self_attention(q, k, v, nhead, *, block_q=_BLOCK_Q):
    # q, k, v: [B, S, D] batch-major; heads packed along the last axis.
    bsz, seq, d_model = q.shape
    dh = d_model // nhead
    tq = _tile(seq, block_q, 8)
    return pl.pallas_call(
        functools.partial(_mha_kernel, nhead=nhead, dh=dh),
        out_shape=jax.ShapeDtypeStruct((bsz, seq, d_model), q.dtype),
        grid=(bsz, seq // tq),
        in_specs=[
            pl.BlockSpec((1, tq, d_model), lambda b, qi: (b, qi, 0)),
            pl.BlockSpec((1, seq, d_model), lambda b, qi: (b, 0, 0)),
            pl.BlockSpec((1, seq, d_model), lambda b, qi: (b, 0, 0)),
        ],
        out_specs=pl.BlockSpec((1, tq, d_model), lambda b, qi: (b, qi, 0)),
        compiler_params=_compiler_params(("parallel", "parallel")),
    )(q, k, v)


# --------- kernel 3: out-proj + residual + LN2 + FFN + residual (fused) -------

def _outproj_ln_ffn_kernel(attn_ref, wo_ref, bo_ref, res_ref, g_ref, b_ref,
                           w1_ref, b1_ref, w2_ref, b2_ref, o_ref,
                           x_scr, xn_scr, acc_scr, *, eps):
    j = pl.program_id(1)

    @pl.when(j == 0)
    def _():
        # attention out-projection + residual, then LN2 — computed once per row
        # tile, kept in VMEM scratch for all dim_ff steps.
        x = jnp.dot(attn_ref[...], wo_ref[...], preferred_element_type=jnp.float32)
        x = x + bo_ref[...].astype(jnp.float32) + res_ref[...].astype(jnp.float32)
        x_scr[...] = x
        mean = jnp.mean(x, axis=-1, keepdims=True)
        var = jnp.mean(jnp.square(x - mean), axis=-1, keepdims=True)
        xn = (x - mean) * jax.lax.rsqrt(var + eps)
        xn_scr[...] = (xn * g_ref[...].astype(jnp.float32)
                       + b_ref[...].astype(jnp.float32))
        acc_scr[...] = jnp.zeros_like(acc_scr)

    # one dim_ff slice: hidden [tm, tf] never leaves VMEM
    xn = xn_scr[...].astype(attn_ref.dtype)
    h = jnp.dot(xn, w1_ref[...], preferred_element_type=jnp.float32)
    h = jnp.maximum(h + b1_ref[...].astype(jnp.float32), 0.0)
    acc_scr[...] += jnp.dot(h.astype(w2_ref.dtype), w2_ref[...],
                            preferred_element_type=jnp.float32)

    @pl.when(j == pl.num_programs(1) - 1)
    def _():
        y = x_scr[...] + acc_scr[...] + b2_ref[...].astype(jnp.float32)
        o_ref[...] = y.astype(o_ref.dtype)


def outproj_ln_ffn_residual(attn2d, wo, bo, res2d, gamma, beta, w1, b1, w2, b2,
                            *, eps=1e-5, block_m=None, block_f=None):
    m, d = attn2d.shape
    f = w1.shape[1]
    tm = _tile(m, block_m or _BLOCK_M, 8)
    tf = _tile(f, block_f or _BLOCK_F, 128)
    return pl.pallas_call(
        functools.partial(_outproj_ln_ffn_kernel, eps=eps),
        out_shape=jax.ShapeDtypeStruct((m, d), res2d.dtype),
        grid=(m // tm, f // tf),
        in_specs=[
            pl.BlockSpec((tm, d), lambda i, j: (i, 0)),   # attn rows (resident across j)
            pl.BlockSpec((d, d), lambda i, j: (0, 0)),    # out_proj weight
            pl.BlockSpec((1, d), lambda i, j: (0, 0)),
            pl.BlockSpec((tm, d), lambda i, j: (i, 0)),   # residual rows
            pl.BlockSpec((1, d), lambda i, j: (0, 0)),    # ln2 gamma
            pl.BlockSpec((1, d), lambda i, j: (0, 0)),    # ln2 beta
            pl.BlockSpec((d, tf), lambda i, j: (0, j)),   # w1 slice
            pl.BlockSpec((1, tf), lambda i, j: (0, j)),   # b1 slice
            pl.BlockSpec((tf, d), lambda i, j: (j, 0)),   # w2 slice
            pl.BlockSpec((1, d), lambda i, j: (0, 0)),    # b2
        ],
        out_specs=pl.BlockSpec((tm, d), lambda i, j: (i, 0)),
        scratch_shapes=[pltpu.VMEM((tm, d), jnp.float32)] * 3,
        compiler_params=_compiler_params(("parallel", "arbitrary")),
    )(attn2d, wo, bo.reshape(1, d), res2d, gamma.reshape(1, d), beta.reshape(1, d),
      w1, b1.reshape(1, f), w2, b2.reshape(1, d))


# ------------------- kernel 4: vocab projection -------------------------------

def _matmul_bias_kernel(x_ref, w_ref, b_ref, o_ref):
    acc = jnp.dot(x_ref[...], w_ref[...], preferred_element_type=jnp.float32)
    o_ref[...] = (acc + b_ref[...].astype(jnp.float32)).astype(o_ref.dtype)


def _ktiled_matmul_bias_kernel(x_ref, w_ref, b_ref, o_ref, acc_ref):
    k = pl.program_id(2)

    @pl.when(k == 0)
    def _():
        acc_ref[...] = jnp.zeros_like(acc_ref)

    acc_ref[...] += jnp.dot(x_ref[...], w_ref[...],
                            preferred_element_type=jnp.float32)

    @pl.when(k == pl.num_programs(2) - 1)
    def _():
        o_ref[...] = (acc_ref[...] + b_ref[...].astype(jnp.float32)).astype(o_ref.dtype)


def vocab_projection(x2d, w, bias, *, block_m=None, block_n=None, block_k=2048):
    """x2d @ w + bias.  `w`/`bias` must already be padded to a 128 multiple
    (done once in prepare_params, never per forward call)."""
    m, kdim = x2d.shape
    n = w.shape[1]
    assert n % 128 == 0, "pad the vocab weight once in prepare_params"
    tm = _tile(m, block_m or _BLOCK_M, 8)
    tn = _tile(n, block_n or _BLOCK_N_VOCAB, 128)
    if kdim <= block_k:
        # full-K: x block index is invariant across the N axis, so Pallas keeps
        # it resident (no per-column-tile re-reads of x, no accumulator).
        return pl.pallas_call(
            _matmul_bias_kernel,
            out_shape=jax.ShapeDtypeStruct((m, n), x2d.dtype),
            grid=(m // tm, n // tn),
            in_specs=[
                pl.BlockSpec((tm, kdim), lambda i, j: (i, 0)),
                pl.BlockSpec((kdim, tn), lambda i, j: (0, j)),
                pl.BlockSpec((1, tn), lambda i, j: (0, j)),
            ],
            out_specs=pl.BlockSpec((tm, tn), lambda i, j: (i, j)),
            compiler_params=_compiler_params(("parallel", "parallel")),
        )(x2d, w, bias.reshape(1, n))
    # very large d_model: K-tiled with f32 VMEM accumulator
    tk = _tile(kdim, block_k, 128)
    return pl.pallas_call(
        _ktiled_matmul_bias_kernel,
        out_shape=jax.ShapeDtypeStruct((m, n), x2d.dtype),
        grid=(m // tm, n // tn, kdim // tk),
        in_specs=[
            pl.BlockSpec((tm, tk), lambda i, j, k: (i, k)),
            pl.BlockSpec((tk, tn), lambda i, j, k: (k, j)),
            pl.BlockSpec((1, tn), lambda i, j, k: (0, j)),
        ],
        out_specs=pl.BlockSpec((tm, tn), lambda i, j, k: (i, j)),
        scratch_shapes=[pltpu.VMEM((tm, tn), jnp.float32)],
        compiler_params=_compiler_params(("parallel", "parallel", "arbitrary")),
    )(x2d, w, bias.reshape(1, n))


# ------------------------------ parameters ------------------------------------

def init_params(key, d_model, nhead, dim_ff, vocab_size, dtype=jnp.float32):
    ks = jax.random.split(key, 5)

    def dense(k, din, dout):
        kw, kb = jax.random.split(k)
        w = jax.random.normal(kw, (din, dout), dtype) * (1.0 / math.sqrt(din))
        b = jax.random.normal(kb, (dout,), dtype) * 0.02
        return w, b

    p = {}
    p["in_proj_w"], p["in_proj_b"] = dense(ks[0], d_model, 3 * d_model)
    p["out_proj_w"], p["out_proj_b"] = dense(ks[1], d_model, d_model)
    p["lin1_w"], p["lin1_b"] = dense(ks[2], d_model, dim_ff)
    p["lin2_w"], p["lin2_b"] = dense(ks[3], dim_ff, d_model)
    p["outproj_w"], p["outproj_b"] = dense(ks[4], d_model, vocab_size)
    p["norm1_g"] = jnp.ones((d_model,), dtype)
    p["norm1_b"] = jnp.zeros((d_model,), dtype)
    p["norm2_g"] = jnp.ones((d_model,), dtype)
    p["norm2_b"] = jnp.zeros((d_model,), dtype)
    return p


def prepare_params(params, nhead):
    """One-time host-side parameter prep (outside the jitted forward):
       * split in_proj into separate Q/K/V weights,
       * fold the 1/sqrt(dh) attention scale into the Q weight/bias,
       * pad the vocab projection to a 128-lane multiple ONCE (not per call).
    Returns (prepared_params, true_vocab_size)."""
    d = params["norm1_g"].shape[0]
    dh = d // nhead
    scale = 1.0 / math.sqrt(dh)
    wq, wk, wv = jnp.split(params["in_proj_w"], 3, axis=1)
    bq, bk, bv = jnp.split(params["in_proj_b"], 3)

    vocab = params["outproj_w"].shape[1]
    pad = (-vocab) % 128
    w_out, b_out = params["outproj_w"], params["outproj_b"]
    if pad:
        w_out = jnp.pad(w_out, ((0, 0), (0, pad)))
        b_out = jnp.pad(b_out, (0, pad))

    prep = {
        "wq": wq * scale, "bq": bq * scale,
        "wk": wk, "bk": bk, "wv": wv, "bv": bv,
        "norm1_g": params["norm1_g"], "norm1_b": params["norm1_b"],
        "norm2_g": params["norm2_g"], "norm2_b": params["norm2_b"],
        "out_proj_w": params["out_proj_w"], "out_proj_b": params["out_proj_b"],
        "lin1_w": params["lin1_w"], "lin1_b": params["lin1_b"],
        "lin2_w": params["lin2_w"], "lin2_b": params["lin2_b"],
        "outproj_w": w_out, "outproj_b": b_out,
    }
    return prep, vocab


# ------------------------------ model wrapper ---------------------------------

@functools.partial(jax.jit, static_argnames=("nhead", "vocab_size"))
def transformer_decoder_forward(tgt, memory, prep, *, nhead, vocab_size):
    del memory                       # the PyTorch forward never reads `memory`
    S, B, D = tgt.shape
    if S > 16 * 768:
        # create_caption_mask() is only nonzero beyond this length.
        raise NotImplementedError("nonzero attention-mask path not implemented")

    # Batch-major activations: attention pulls (1, tq, D) / (1, S, D) blocks
    # directly — no head split/merge transposes, no mask DMAs.
    xb = jnp.transpose(tgt, (1, 0, 2)).reshape(B * S, D)

    # --- self-attention block (pre-norm) ---
    q, k, v = ln_qkv(xb, prep["norm1_g"], prep["norm1_b"],
                     prep["wq"], prep["bq"], prep["wk"], prep["bk"],
                     prep["wv"], prep["bv"])                           # 3x [B*S, D]
    attn = self_attention(q.reshape(B, S, D), k.reshape(B, S, D),
                          v.reshape(B, S, D), nhead).reshape(B * S, D)

    # --- out-proj + residual + LN2 + FFN + residual, fused (one [M,D] HBM
    #     round-trip removed; dim_ff hidden never leaves VMEM) ---
    x = outproj_ln_ffn_residual(attn, prep["out_proj_w"], prep["out_proj_b"], xb,
                                prep["norm2_g"], prep["norm2_b"],
                                prep["lin1_w"], prep["lin1_b"],
                                prep["lin2_w"], prep["lin2_b"])        # [B*S, D]

    # back to sequence-major before the (big) vocab projection so it writes
    # [S, B, Vpad] directly.
    x_sm = jnp.transpose(x.reshape(B, S, D), (1, 0, 2)).reshape(S * B, D)
    out = vocab_projection(x_sm, prep["outproj_w"], prep["outproj_b"])
    out = out.reshape(S, B, -1)
    if out.shape[-1] != vocab_size:
        # only when the vocab was padded; ideally sliced lazily at the consumer
        out = out[..., :vocab_size]
    return out


# --------------------------- pure-JAX reference -------------------------------

def reference_forward(tgt, memory, params, nhead):
    del memory
    S, B, D = tgt.shape
    H = nhead
    Dh = D // H
    mask = jnp.full((S, S), -jnp.inf, dtype=jnp.float32)
    mask = mask.at[:, : 16 * 768].set(0.0)
    mask = jnp.triu(mask, k=1)        # all zeros for S <= 16*768

    def ln(x, g, b):
        m = jnp.mean(x, -1, keepdims=True)
        v = jnp.mean((x - m) ** 2, -1, keepdims=True)
        return (x - m) * jax.lax.rsqrt(v + 1e-5) * g + b

    x = tgt
    x2 = ln(x, params["norm1_g"], params["norm1_b"])
    qkv = x2.reshape(S * B, D) @ params["in_proj_w"] + params["in_proj_b"]
    q, k, v = jnp.split(qkv.reshape(S, B, 3 * D), 3, axis=-1)
    q = q.reshape(S, B * H, Dh).transpose(1, 0, 2) / math.sqrt(Dh)
    k = k.reshape(S, B * H, Dh).transpose(1, 0, 2)
    v = v.reshape(S, B * H, Dh).transpose(1, 0, 2)
    s = jnp.einsum("bqd,bkd->bqk", q, k) + mask
    p = jax.nn.softmax(s, axis=-1)
    a = jnp.einsum("bqk,bkd->bqd", p, v).transpose(1, 0, 2).reshape(S * B, D)
    a = a @ params["out_proj_w"] + params["out_proj_b"]
    x = x + a.reshape(S, B, D)
    x2 = ln(x, params["norm2_g"], params["norm2_b"]).reshape(S * B, D)
    h = jnp.maximum(x2 @ params["lin1_w"] + params["lin1_b"], 0.0)
    h = h @ params["lin2_w"] + params["lin2_b"]
    x = x + h.reshape(S, B, D)
    out = x.reshape(S * B, D) @ params["outproj_w"] + params["outproj_b"]
    return out.reshape(S, B, -1)


# ----------------------------------- main -------------------------------------

if __name__ == "__main__":
    # small, module-consistent shapes
    d_model, nhead, dim_ff, vocab_size = 64, 4, 128, 512
    S, B = 8, 2

    key = jax.random.PRNGKey(0)
    kp, kt, km = jax.random.split(key, 3)
    params = init_params(kp, d_model, nhead, dim_ff, vocab_size)
    prep, vocab = prepare_params(params, nhead)
    tgt = jax.random.normal(kt, (S, B, d_model), jnp.float32)
    memory = jax.random.normal(km, (S, B, d_model), jnp.float32)

    out = transformer_decoder_forward(tgt, memory, prep, nhead=nhead,
                                      vocab_size=vocab)
    out = jax.block_until_ready(out)

    ref = reference_forward(tgt, memory, params, nhead)
    assert out.shape == (S, B, vocab_size), out.shape
    err = float(jnp.max(jnp.abs(out - ref)))
    assert jnp.allclose(out, ref, rtol=2e-3, atol=2e-3), err

    print("KERNEL_OK")
</pallas_src>

<mosaic_0001>
module attributes {stable_mosaic.version = 11 : i64} {
  func.func @_ln_qkv_kernel(%arg0: i32, %arg1: memref<16x64xf32, #tpu.memory_space<vmem>>, %arg2: memref<1x64xf32, #tpu.memory_space<vmem>>, %arg3: memref<1x64xf32, #tpu.memory_space<vmem>>, %arg4: memref<64x64xf32, #tpu.memory_space<vmem>>, %arg5: memref<1x64xf32, #tpu.memory_space<vmem>>, %arg6: memref<64x64xf32, #tpu.memory_space<vmem>>, %arg7: memref<1x64xf32, #tpu.memory_space<vmem>>, %arg8: memref<64x64xf32, #tpu.memory_space<vmem>>, %arg9: memref<1x64xf32, #tpu.memory_space<vmem>>, %arg10: memref<16x64xf32, #tpu.memory_space<vmem>>, %arg11: memref<16x64xf32, #tpu.memory_space<vmem>>, %arg12: memref<16x64xf32, #tpu.memory_space<vmem>>) attributes {dimension_semantics = [#tpu.dimension_semantics<parallel>], iteration_bounds = array<i64: 1>, scalar_prefetch = 0 : i64, scratch_operands = 0 : i64, tpu.core_type = #tpu.core_type<tc>, window_params = [{transform_indices = @transform_0, window_bounds = array<i64: 16, 64>}, {pipeline_mode = #tpu.pipeline_mode<synchronous>, transform_indices = @transform_1, window_bounds = array<i64: 1, 64>}, {pipeline_mode = #tpu.pipeline_mode<synchronous>, transform_indices = @transform_2, window_bounds = array<i64: 1, 64>}, {pipeline_mode = #tpu.pipeline_mode<synchronous>, transform_indices = @transform_3, window_bounds = array<i64: 64, 64>}, {pipeline_mode = #tpu.pipeline_mode<synchronous>, transform_indices = @transform_4, window_bounds = array<i64: 1, 64>}, {pipeline_mode = #tpu.pipeline_mode<synchronous>, transform_indices = @transform_5, window_bounds = array<i64: 64, 64>}, {pipeline_mode = #tpu.pipeline_mode<synchronous>, transform_indices = @transform_6, window_bounds = array<i64: 1, 64>}, {pipeline_mode = #tpu.pipeline_mode<synchronous>, transform_indices = @transform_7, window_bounds = array<i64: 64, 64>}, {pipeline_mode = #tpu.pipeline_mode<synchronous>, transform_indices = @transform_8, window_bounds = array<i64: 1, 64>}, {transform_indices = @transform_9, window_bounds = array<i64: 16, 64>}, {transform_indices = @transform_10, window_bounds = array<i64: 16, 64>}, {transform_indices = @transform_11, window_bounds = array<i64: 16, 64>}]} {
    %c0 = arith.constant 0 : index
    %c0_0 = arith.constant 0 : index
    %0 = vector.load %arg1[%c0, %c0_0] : memref<16x64xf32, #tpu.memory_space<vmem>>, vector<16x64xf32>
    %cst = arith.constant dense<0.000000e+00> : vector<16xf32>
    %1 = vector.multi_reduction <add>, %0, %cst [1] : vector<16x64xf32> to vector<16xf32>
    %2 = vector.shape_cast %1 : vector<16xf32> to vector<16x1xf32>
    %cst_1 = arith.constant 6.400000e+01 : f32
    %3 = vector.broadcast %cst_1 : f32 to vector<16x1xf32>
    %4 = arith.divf %2, %3 : vector<16x1xf32>
    %5 = vector.broadcast %4 : vector<16x1xf32> to vector<16x64xf32>
    %6 = arith.subf %0, %5 : vector<16x64xf32>
    %7 = arith.mulf %6, %6 : vector<16x64xf32>
    %cst_2 = arith.constant dense<0.000000e+00> : vector<16xf32>
    %8 = vector.multi_reduction <add>, %7, %cst_2 [1] : vector<16x64xf32> to vector<16xf32>
    %9 = vector.shape_cast %8 : vector<16xf32> to vector<16x1xf32>
    %cst_3 = arith.constant 6.400000e+01 : f32
    %10 = vector.broadcast %cst_3 : f32 to vector<16x1xf32>
    %11 = arith.divf %9, %10 : vector<16x1xf32>
    %12 = vector.broadcast %4 : vector<16x1xf32> to vector<16x64xf32>
    %13 = arith.subf %0, %12 : vector<16x64xf32>
    %cst_4 = arith.constant 9.99999974E-6 : f32
    %14 = vector.broadcast %cst_4 : f32 to vector<16x1xf32>
    %15 = arith.addf %11, %14 : vector<16x1xf32>
    %16 = math.rsqrt %15 : vector<16x1xf32>
    %17 = vector.broadcast %16 : vector<16x1xf32> to vector<16x64xf32>
    %18 = arith.mulf %13, %17 : vector<16x64xf32>
    %c0_5 = arith.constant 0 : index
    %c0_6 = arith.constant 0 : index
    %19 = vector.load %arg2[%c0_5, %c0_6] : memref<1x64xf32, #tpu.memory_space<vmem>>, vector<1x64xf32>
    %20 = vector.broadcast %19 : vector<1x64xf32> to vector<16x64xf32>
    %21 = arith.mulf %18, %20 : vector<16x64xf32>
    %c0_7 = arith.constant 0 : index
    %c0_8 = arith.constant 0 : index
    %22 = vector.load %arg3[%c0_7, %c0_8] : memref<1x64xf32, #tpu.memory_space<vmem>>, vector<1x64xf32>
    %23 = vector.broadcast %22 : vector<1x64xf32> to vector<16x64xf32>
    %24 = arith.addf %21, %23 : vector<16x64xf32>
    %c0_9 = arith.constant 0 : index
    %c0_10 = arith.constant 0 : index
    %25 = vector.load %arg4[%c0_9, %c0_10] : memref<64x64xf32, #tpu.memory_space<vmem>>, vector<64x64xf32>
    %cst_11 = arith.constant dense<0.000000e+00> : vector<16x64xf32>
    %26 = tpu.matmul %24, %25, %cst_11 {dimension_numbers = #tpu.dot_dimension_numbers<[1], [0], [0], [1], [0, 0, 1, 1], [], []>} : vector<16x64xf32>, vector<64x64xf32>, vector<16x64xf32> -> vector<16x64xf32>
    %c0_12 = arith.constant 0 : index
    %c0_13 = arith.constant 0 : index
    %27 = vector.load %arg5[%c0_12, %c0_13] : memref<1x64xf32, #tpu.memory_space<vmem>>, vector<1x64xf32>
    %28 = vector.broadcast %27 : vector<1x64xf32> to vector<16x64xf32>
    %29 = arith.addf %26, %28 : vector<16x64xf32>
    %c0_14 = arith.constant 0 : index
    %c0_15 = arith.constant 0 : index
    %30 = vector.load %arg10[%c0_14, %c0_15] : memref<16x64xf32, #tpu.memory_space<vmem>>, vector<16x64xf32>
    tpu.vector_store %arg10[%c0_14, %c0_15], %29 {strides = array<i32>} : memref<16x64xf32, #tpu.memory_space<vmem>>, vector<16x64xf32>,
    %c0_16 = arith.constant 0 : index
    %c0_17 = arith.constant 0 : index
    %31 = vector.load %arg6[%c0_16, %c0_17] : memref<64x64xf32, #tpu.memory_space<vmem>>, vector<64x64xf32>
    %cst_18 = arith.constant dense<0.000000e+00> : vector<16x64xf32>
    %32 = tpu.matmul %24, %31, %cst_18 {dimension_numbers = #tpu.dot_dimension_numbers<[1], [0], [0], [1], [0, 0, 1, 1], [], []>} : vector<16x64xf32>, vector<64x64xf32>, vector<16x64xf32> -> vector<16x64xf32>
    %c0_19 = arith.constant 0 : index
    %c0_20 = arith.constant 0 : index
    %33 = vector.load %arg7[%c0_19, %c0_20] : memref<1x64xf32, #tpu.memory_space<vmem>>, vector<1x64xf32>
    %34 = vector.broadcast %33 : vector<1x64xf32> to vector<16x64xf32>
    %35 = arith.addf %32, %34 : vector<16x64xf32>
    %c0_21 = arith.constant 0 : index
    %c0_22 = arith.constant 0 : index
    %36 = vector.load %arg11[%c0_21, %c0_22] : memref<16x64xf32, #tpu.memory_space<vmem>>, vector<16x64xf32>
    tpu.vector_store %arg11[%c0_21, %c0_22], %35 {strides = array<i32>} : memref<16x64xf32, #tpu.memory_space<vmem>>, vector<16x64xf32>,
    %c0_23 = arith.constant 0 : index
    %c0_24 = arith.constant 0 : index
    %37 = vector.load %arg8[%c0_23, %c0_24] : memref<64x64xf32, #tpu.memory_space<vmem>>, vector<64x64xf32>
    %cst_25 = arith.constant dense<0.000000e+00> : vector<16x64xf32>
    %38 = tpu.matmul %24, %37, %cst_25 {dimension_numbers = #tpu.dot_dimension_numbers<[1], [0], [0], [1], [0, 0, 1, 1], [], []>} : vector<16x64xf32>, vector<64x64xf32>, vector<16x64xf32> -> vector<16x64xf32>
    %c0_26 = arith.constant 0 : index
    %c0_27 = arith.constant 0 : index
    %39 = vector.load %arg9[%c0_26, %c0_27] : memref<1x64xf32, #tpu.memory_space<vmem>>, vector<1x64xf32>
    %40 = vector.broadcast %39 : vector<1x64xf32> to vector<16x64xf32>
    %41 = arith.addf %38, %40 : vector<16x64xf32>
    %c0_28 = arith.constant 0 : index
    %c0_29 = arith.constant 0 : index
    %42 = vector.load %arg12[%c0_28, %c0_29] : memref<16x64xf32, #tpu.memory_space<vmem>>, vector<16x64xf32>
    tpu.vector_store %arg12[%c0_28, %c0_29], %41 {strides = array<i32>} : memref<16x64xf32, #tpu.memory_space<vmem>>, vector<16x64xf32>,
    return
  }
  func.func @transform_0(%arg0: i32) -> (i32, i32) {
    %c0_i32 = arith.constant 0 : i32
    %c0_i32_0 = arith.constant 0 : i32
    return %arg0, %c0_i32 : i32, i32
  }
  func.func @transform_1(%arg0: i32) -> (i32, i32) {
    %c0_i32 = arith.constant 0 : i32
    %c0_i32_0 = arith.constant 0 : i32
    %c0_i32_1 = arith.constant 0 : i32
    return %c0_i32, %c0_i32_0 : i32, i32
  }
  func.func @transform_2(%arg0: i32) -> (i32, i32) {
    %c0_i32 = arith.constant 0 : i32
    %c0_i32_0 = arith.constant 0 : i32
    %c0_i32_1 = arith.constant 0 : i32
    return %c0_i32, %c0_i32_0 : i32, i32
  }
  func.func @transform_3(%arg0: i32) -> (i32, i32) {
    %c0_i32 = arith.constant 0 : i32
    %c0_i32_0 = arith.constant 0 : i32
    %c0_i32_1 = arith.constant 0 : i32
    return %c0_i32, %c0_i32_0 : i32, i32
  }
  func.func @transform_4(%arg0: i32) -> (i32, i32) {
    %c0_i32 = arith.constant 0 : i32
    %c0_i32_0 = arith.constant 0 : i32
    %c0_i32_1 = arith.constant 0 : i32
    return %c0_i32, %c0_i32_0 : i32, i32
  }
  func.func @transform_5(%arg0: i32) -> (i32, i32) {
    %c0_i32 = arith.constant 0 : i32
    %c0_i32_0 = arith.constant 0 : i32
    %c0_i32_1 = arith.constant 0 : i32
    return %c0_i32, %c0_i32_0 : i32, i32
  }
  func.func @transform_6(%arg0: i32) -> (i32, i32) {
    %c0_i32 = arith.constant 0 : i32
    %c0_i32_0 = arith.constant 0 : i32
    %c0_i32_1 = arith.constant 0 : i32
    return %c0_i32, %c0_i32_0 : i32, i32
  }
  func.func @transform_7(%arg0: i32) -> (i32, i32) {
    %c0_i32 = arith.constant 0 : i32
    %c0_i32_0 = arith.constant 0 : i32
    %c0_i32_1 = arith.constant 0 : i32
    return %c0_i32, %c0_i32_0 : i32, i32
  }
  func.func @transform_8(%arg0: i32) -> (i32, i32) {
    %c0_i32 = arith.constant 0 : i32
    %c0_i32_0 = arith.constant 0 : i32
    %c0_i32_1 = arith.constant 0 : i32
    return %c0_i32, %c0_i32_0 : i32, i32
  }
  func.func @transform_9(%arg0: i32) -> (i32, i32) {
    %c0_i32 = arith.constant 0 : i32
    %c0_i32_0 = arith.constant 0 : i32
    return %arg0, %c0_i32 : i32, i32
  }
  func.func @transform_10(%arg0: i32) -> (i32, i32) {
    %c0_i32 = arith.constant 0 : i32
    %c0_i32_0 = arith.constant 0 : i32
    return %arg0, %c0_i32 : i32, i32
  }
  func.func @transform_11(%arg0: i32) -> (i32, i32) {
    %c0_i32 = arith.constant 0 : i32
    %c0_i32_0 = arith.constant 0 : i32
    return %arg0, %c0_i32 : i32, i32
  }
}

module attributes {stable_mosaic.version = 11 : i64} {
  func.func @_mha_kernel(%arg0: i32, %arg1: i32, %arg2: memref<1x8x64xf32, #tpu.memory_space<vmem>>, %arg3: memref<1x8x64xf32, #tpu.memory_space<vmem>>, %arg4: memref<1x8x64xf32, #tpu.memory_space<vmem>>, %arg5: memref<1x8x64xf32, #tpu.memory_space<vmem>>) attributes {dimension_semantics = [#tpu.dimension_semantics<parallel>, #tpu.dimension_semantics<parallel>], iteration_bounds = array<i64: 2, 1>, scalar_prefetch = 0 : i64, scratch_operands = 0 : i64, tpu.core_type = #tpu.core_type<tc>, window_params = [{transform_indices = @transform_0, window_bounds = array<i64: 1, 8, 64>}, {transform_indices = @transform_1, window_bounds = array<i64: 1, 8, 64>}, {transform_indices = @transform_2, window_bounds = array<i64: 1, 8, 64>}, {transform_indices = @transform_3, window_bounds = array<i64: 1, 8, 64>}]} {
    %c0 = arith.constant 0 : index
    %c0_0 = arith.constant 0 : index
    %c0_1 = arith.constant 0 : index
    %0 = vector.load %arg2[%c0, %c0_0, %c0_1] : memref<1x8x64xf32, #tpu.memory_space<vmem>>, vector<1x8x64xf32>
    %1 = vector.shape_cast %0 : vector<1x8x64xf32> to vector<8x64xf32>
    %c0_2 = arith.constant 0 : index
    %c0_3 = arith.constant 0 : index
    %c0_4 = arith.constant 0 : index
    %2 = vector.load %arg3[%c0_2, %c0_3, %c0_4] : memref<1x8x64xf32, #tpu.memory_space<vmem>>, vector<1x8x64xf32>
    %3 = vector.shape_cast %2 : vector<1x8x64xf32> to vector<8x64xf32>
    %c0_5 = arith.constant 0 : index
    %c0_6 = arith.constant 0 : index
    %c0_7 = arith.constant 0 : index
    %4 = vector.load %arg4[%c0_5, %c0_6, %c0_7] : memref<1x8x64xf32, #tpu.memory_space<vmem>>, vector<1x8x64xf32>
    %5 = vector.shape_cast %4 : vector<1x8x64xf32> to vector<8x64xf32>
    %6 = vector.extract_strided_slice %1 {offsets = [0, 0], sizes = [8, 16], strides = [1, 1]} : vector<8x64xf32> to vector<8x16xf32>
    %7 = vector.extract_strided_slice %3 {offsets = [0, 0], sizes = [8, 16], strides = [1, 1]} : vector<8x64xf32> to vector<8x16xf32>
    %8 = vector.extract_strided_slice %5 {offsets = [0, 0], sizes = [8, 16], strides = [1, 1]} : vector<8x64xf32> to vector<8x16xf32>
    %cst = arith.constant dense<0.000000e+00> : vector<8x8xf32>
    %9 = tpu.matmul %6, %7, %cst {dimension_numbers = #tpu.dot_dimension_numbers<[1], [1], [0], [0], [0, 0, 1, 0], [], []>} : vector<8x16xf32>, vector<8x16xf32>, vector<8x8xf32> -> vector<8x8xf32>
    %cst_8 = arith.constant dense<0xFF800000> : vector<8xf32>
    %10 = vector.multi_reduction <maximumf>, %9, %cst_8 [1] : vector<8x8xf32> to vector<8xf32>
    %11 = vector.shape_cast %10 : vector<8xf32> to vector<8x1xf32>
    %12 = vector.broadcast %11 : vector<8x1xf32> to vector<8x8xf32>
    %13 = arith.subf %9, %12 : vector<8x8xf32>
    %14 = math.exp %13 : vector<8x8xf32>
    %cst_9 = arith.constant dense<0.000000e+00> : vector<8xf32>
    %15 = vector.multi_reduction <add>, %14, %cst_9 [1] : vector<8x8xf32> to vector<8xf32>
    %16 = vector.shape_cast %15 : vector<8xf32> to vector<8x1xf32>
    %17 = vector.broadcast %16 : vector<8x1xf32> to vector<8x8xf32>
    %18 = arith.divf %14, %17 : vector<8x8xf32>
    %cst_10 = arith.constant dense<0.000000e+00> : vector<8x16xf32>
    %19 = tpu.matmul %18, %8, %cst_10 {dimension_numbers = #tpu.dot_dimension_numbers<[1], [0], [0], [1], [0, 0, 1, 1], [], []>} : vector<8x8xf32>, vector<8x16xf32>, vector<8x16xf32> -> vector<8x16xf32>
    %c0_11 = arith.constant 0 : index
    %c0_12 = arith.constant 0 : index
    %c0_13 = arith.constant 0 : index
    %20 = vector.load %arg5[%c0_11, %c0_12, %c0_13] : memref<1x8x64xf32, #tpu.memory_space<vmem>>, vector<1x8x16xf32>
    %21 = vector.shape_cast %20 : vector<1x8x16xf32> to vector<8x16xf32>
    %22 = vector.shape_cast %19 : vector<8x16xf32> to vector<1x8x16xf32>
    tpu.vector_store %arg5[%c0_11, %c0_12, %c0_13], %22 {strides = array<i32>} : memref<1x8x64xf32, #tpu.memory_space<vmem>>, vector<1x8x16xf32>,
    %23 = vector.extract_strided_slice %1 {offsets = [0, 16], sizes = [8, 16], strides = [1, 1]} : vector<8x64xf32> to vector<8x16xf32>
    %24 = vector.extract_strided_slice %3 {offsets = [0, 16], sizes = [8, 16], strides = [1, 1]} : vector<8x64xf32> to vector<8x16xf32>
    %25 = vector.extract_strided_slice %5 {offsets = [0, 16], sizes = [8, 16], strides = [1, 1]} : vector<8x64xf32> to vector<8x16xf32>
    %cst_14 = arith.constant dense<0.000000e+00> : vector<8x8xf32>
    %26 = tpu.matmul %23, %24, %cst_14 {dimension_numbers = #tpu.dot_dimension_numbers<[1], [1], [0], [0], [0, 0, 1, 0], [], []>} : vector<8x16xf32>, vector<8x16xf32>, vector<8x8xf32> -> vector<8x8xf32>
    %cst_15 = arith.constant dense<0xFF800000> : vector<8xf32>
    %27 = vector.multi_reduction <maximumf>, %26, %cst_15 [1] : vector<8x8xf32> to vector<8xf32>
    %28 = vector.shape_cast %27 : vector<8xf32> to vector<8x1xf32>
    %29 = vector.broadcast %28 : vector<8x1xf32> to vector<8x8xf32>
    %30 = arith.subf %26, %29 : vector<8x8xf32>
    %31 = math.exp %30 : vector<8x8xf32>
    %cst_16 = arith.constant dense<0.000000e+00> : vector<8xf32>
    %32 = vector.multi_reduction <add>, %31, %cst_16 [1] : vector<8x8xf32> to vector<8xf32>
    %33 = vector.shape_cast %32 : vector<8xf32> to vector<8x1xf32>
    %34 = vector.broadcast %33 : vector<8x1xf32> to vector<8x8xf32>
    %35 = arith.divf %31, %34 : vector<8x8xf32>
    %cst_17 = arith.constant dense<0.000000e+00> : vector<8x16xf32>
    %36 = tpu.matmul %35, %25, %cst_17 {dimension_numbers = #tpu.dot_dimension_numbers<[1], [0], [0], [1], [0, 0, 1, 1], [], []>} : vector<8x8xf32>, vector<8x16xf32>, vector<8x16xf32> -> vector<8x16xf32>
    %c0_18 = arith.constant 0 : index
    %c0_19 = arith.constant 0 : index
    %c16 = arith.constant 16 : index
    %37 = vector.load %arg5[%c0_18, %c0_19, %c16] : memref<1x8x64xf32, #tpu.memory_space<vmem>>, vector<1x8x16xf32>
    %38 = vector.shape_cast %37 : vector<1x8x16xf32> to vector<8x16xf32>
    %39 = vector.shape_cast %36 : vector<8x16xf32> to vector<1x8x16xf32>
    tpu.vector_store %arg5[%c0_18, %c0_19, %c16], %39 {strides = array<i32>} : memref<1x8x64xf32, #tpu.memory_space<vmem>>, vector<1x8x16xf32>,
    %40 = vector.extract_strided_slice %1 {offsets = [0, 32], sizes = [8, 16], strides = [1, 1]} : vector<8x64xf32> to vector<8x16xf32>
    %41 = vector.extract_strided_slice %3 {offsets = [0, 32], sizes = [8, 16], strides = [1, 1]} : vector<8x64xf32> to vector<8x16xf32>
    %42 = vector.extract_strided_slice %5 {offsets = [0, 32], sizes = [8, 16], strides = [1, 1]} : vector<8x64xf32> to vector<8x16xf32>
    %cst_20 = arith.constant dense<0.000000e+00> : vector<8x8xf32>
    %43 = tpu.matmul %40, %41, %cst_20 {dimension_numbers = #tpu.dot_dimension_numbers<[1], [1], [0], [0], [0, 0, 1, 0], [], []>} : vector<8x16xf32>, vector<8x16xf32>, vector<8x8xf32> -> vector<8x8xf32>
    %cst_21 = arith.constant dense<0xFF800000> : vector<8xf32>
    %44 = vector.multi_reduction <maximumf>, %43, %cst_21 [1] : vector<8x8xf32> to vector<8xf32>
    %45 = vector.shape_cast %44 : vector<8xf32> to vector<8x1xf32>
    %46 = vector.broadcast %45 : vector<8x1xf32> to vector<8x8xf32>
    %47 = arith.subf %43, %46 : vector<8x8xf32>
    %48 = math.exp %47 : vector<8x8xf32>
    %cst_22 = arith.constant dense<0.000000e+00> : vector<8xf32>
    %49 = vector.multi_reduction <add>, %48, %cst_22 [1] : vector<8x8xf32> to vector<8xf32>
    %50 = vector.shape_cast %49 : vector<8xf32> to vector<8x1xf32>
    %51 = vector.broadcast %50 : vector<8x1xf32> to vector<8x8xf32>
    %52 = arith.divf %48, %51 : vector<8x8xf32>
    %cst_23 = arith.constant dense<0.000000e+00> : vector<8x16xf32>
    %53 = tpu.matmul %52, %42, %cst_23 {dimension_numbers = #tpu.dot_dimension_numbers<[1], [0], [0], [1], [0, 0, 1, 1], [], []>} : vector<8x8xf32>, vector<8x16xf32>, vector<8x16xf32> -> vector<8x16xf32>
    %c0_24 = arith.constant 0 : index
    %c0_25 = arith.constant 0 : index
    %c32 = arith.constant 32 : index
    %54 = vector.load %arg5[%c0_24, %c0_25, %c32] : memref<1x8x64xf32, #tpu.memory_space<vmem>>, vector<1x8x16xf32>
    %55 = vector.shape_cast %54 : vector<1x8x16xf32> to vector<8x16xf32>
    %56 = vector.shape_cast %53 : vector<8x16xf32> to vector<1x8x16xf32>
    tpu.vector_store %arg5[%c0_24, %c0_25, %c32], %56 {strides = array<i32>} : memref<1x8x64xf32, #tpu.memory_space<vmem>>, vector<1x8x16xf32>,
    %57 = vector.extract_strided_slice %1 {offsets = [0, 48], sizes = [8, 16], strides = [1, 1]} : vector<8x64xf32> to vector<8x16xf32>
    %58 = vector.extract_strided_slice %3 {offsets = [0, 48], sizes = [8, 16], strides = [1, 1]} : vector<8x64xf32> to vector<8x16xf32>
    %59 = vector.extract_strided_slice %5 {offsets = [0, 48], sizes = [8, 16], strides = [1, 1]} : vector<8x64xf32> to vector<8x16xf32>
    %cst_26 = arith.constant dense<0.000000e+00> : vector<8x8xf32>
    %60 = tpu.matmul %57, %58, %cst_26 {dimension_numbers = #tpu.dot_dimension_numbers<[1], [1], [0], [0], [0, 0, 1, 0], [], []>} : vector<8x16xf32>, vector<8x16xf32>, vector<8x8xf32> -> vector<8x8xf32>
    %cst_27 = arith.constant dense<0xFF800000> : vector<8xf32>
    %61 = vector.multi_reduction <maximumf>, %60, %cst_27 [1] : vector<8x8xf32> to vector<8xf32>
    %62 = vector.shape_cast %61 : vector<8xf32> to vector<8x1xf32>
    %63 = vector.broadcast %62 : vector<8x1xf32> to vector<8x8xf32>
    %64 = arith.subf %60, %63 : vector<8x8xf32>
    %65 = math.exp %64 : vector<8x8xf32>
    %cst_28 = arith.constant dense<0.000000e+00> : vector<8xf32>
    %66 = vector.multi_reduction <add>, %65, %cst_28 [1] : vector<8x8xf32> to vector<8xf32>
    %67 = vector.shape_cast %66 : vector<8xf32> to vector<8x1xf32>
    %68 = vector.broadcast %67 : vector<8x1xf32> to vector<8x8xf32>
    %69 = arith.divf %65, %68 : vector<8x8xf32>
    %cst_29 = arith.constant dense<0.000000e+00> : vector<8x16xf32>
    %70 = tpu.matmul %69, %59, %cst_29 {dimension_numbers = #tpu.dot_dimension_numbers<[1], [0], [0], [1], [0, 0, 1, 1], [], []>} : vector<8x8xf32>, vector<8x16xf32>, vector<8x16xf32> -> vector<8x16xf32>
    %c0_30 = arith.constant 0 : index
    %c0_31 = arith.constant 0 : index
    %c48 = arith.constant 48 : index
    %71 = vector.load %arg5[%c0_30, %c0_31, %c48] : memref<1x8x64xf32, #tpu.memory_space<vmem>>, vector<1x8x16xf32>
    %72 = vector.shape_cast %71 : vector<1x8x16xf32> to vector<8x16xf32>
    %73 = vector.shape_cast %70 : vector<8x16xf32> to vector<1x8x16xf32>
    tpu.vector_store %arg5[%c0_30, %c0_31, %c48], %73 {strides = array<i32>} : memref<1x8x64xf32, #tpu.memory_space<vmem>>, vector<1x8x16xf32>,
    return
  }
  func.func @transform_0(%arg0: i32, %arg1: i32) -> (i32, i32, i32) {
    %c0_i32 = arith.constant 0 : i32
    %c0_i32_0 = arith.constant 0 : i32
    return %arg0, %arg1, %c0_i32 : i32, i32, i32
  }
  func.func @transform_1(%arg0: i32, %arg1: i32) -> (i32, i32, i32) {
    %c0_i32 = arith.constant 0 : i32
    %c0_i32_0 = arith.constant 0 : i32
    %c0_i32_1 = arith.constant 0 : i32
    return %arg0, %c0_i32, %c0_i32_0 : i32, i32, i32
  }
  func.func @transform_2(%arg0: i32, %arg1: i32) -> (i32, i32, i32) {
    %c0_i32 = arith.constant 0 : i32
    %c0_i32_0 = arith.constant 0 : i32
    %c0_i32_1 = arith.constant 0 : i32
    return %arg0, %c0_i32, %c0_i32_0 : i32, i32, i32
  }
  func.func @transform_3(%arg0: i32, %arg1: i32) -> (i32, i32, i32) {
    %c0_i32 = arith.constant 0 : i32
    %c0_i32_0 = arith.constant 0 : i32
    return %arg0, %arg1, %c0_i32 : i32, i32, i32
  }
}

module attributes {stable_mosaic.version = 11 : i64} {
  func.func @_outproj_ln_ffn_kernel(%arg0: i32, %arg1: i32, %arg2: memref<16x64xf32, #tpu.memory_space<vmem>>, %arg3: memref<64x64xf32, #tpu.memory_space<vmem>>, %arg4: memref<1x64xf32, #tpu.memory_space<vmem>>, %arg5: memref<16x64xf32, #tpu.memory_space<vmem>>, %arg6: memref<1x64xf32, #tpu.memory_space<vmem>>, %arg7: memref<1x64xf32, #tpu.memory_space<vmem>>, %arg8: memref<64x128xf32, #tpu.memory_space<vmem>>, %arg9: memref<1x128xf32, #tpu.memory_space<vmem>>, %arg10: memref<128x64xf32, #tpu.memory_space<vmem>>, %arg11: memref<1x64xf32, #tpu.memory_space<vmem>>, %arg12: memref<16x64xf32, #tpu.memory_space<vmem>>, %arg13: memref<16x64xf32, #tpu.memory_space<vmem>>, %arg14: memref<16x64xf32, #tpu.memory_space<vmem>>, %arg15: memref<16x64xf32, #tpu.memory_space<vmem>>) attributes {dimension_semantics = [#tpu.dimension_semantics<parallel>, #tpu.dimension_semantics<arbitrary>], iteration_bounds = array<i64: 1, 1>, scalar_prefetch = 0 : i64, scratch_operands = 3 : i64, tpu.core_type = #tpu.core_type<tc>, window_params = [{transform_indices = @transform_0, window_bounds = array<i64: 16, 64>}, {pipeline_mode = #tpu.pipeline_mode<synchronous>, transform_indices = @transform_1, window_bounds = array<i64: 64, 64>}, {pipeline_mode = #tpu.pipeline_mode<synchronous>, transform_indices = @transform_2, window_bounds = array<i64: 1, 64>}, {transform_indices = @transform_3, window_bounds = array<i64: 16, 64>}, {pipeline_mode = #tpu.pipeline_mode<synchronous>, transform_indices = @transform_4, window_bounds = array<i64: 1, 64>}, {pipeline_mode = #tpu.pipeline_mode<synchronous>, transform_indices = @transform_5, window_bounds = array<i64: 1, 64>}, {transform_indices = @transform_6, window_bounds = array<i64: 64, 128>}, {transform_indices = @transform_7, window_bounds = array<i64: 1, 128>}, {transform_indices = @transform_8, window_bounds = array<i64: 128, 64>}, {pipeline_mode = #tpu.pipeline_mode<synchronous>, transform_indices = @transform_9, window_bounds = array<i64: 1, 64>}, {transform_indices = @transform_10, window_bounds = array<i64: 16, 64>}]} {
    %c0_i32 = arith.constant 0 : i32
    %0 = arith.cmpi eq, %arg1, %c0_i32 : i32
    %1 = arith.extui %0 : i1 to i32
    %c0_i32_0 = arith.constant 0 : i32
    %2 = arith.cmpi ne, %1, %c0_i32_0 : i32
    scf.if %2 {
      %c0_16 = arith.constant 0 : index
      %c0_17 = arith.constant 0 : index
      %19 = vector.load %arg2[%c0_16, %c0_17] : memref<16x64xf32, #tpu.memory_space<vmem>>, vector<16x64xf32>
      %c0_18 = arith.constant 0 : index
      %c0_19 = arith.constant 0 : index
      %20 = vector.load %arg3[%c0_18, %c0_19] : memref<64x64xf32, #tpu.memory_space<vmem>>, vector<64x64xf32>
      %cst_20 = arith.constant dense<0.000000e+00> : vector<16x64xf32>
      %21 = tpu.matmul %19, %20, %cst_20 {dimension_numbers = #tpu.dot_dimension_numbers<[1], [0], [0], [1], [0, 0, 1, 1], [], []>} : vector<16x64xf32>, vector<64x64xf32>, vector<16x64xf32> -> vector<16x64xf32>
      %c0_21 = arith.constant 0 : index
      %c0_22 = arith.constant 0 : index
      %22 = vector.load %arg4[%c0_21, %c0_22] : memref<1x64xf32, #tpu.memory_space<vmem>>, vector<1x64xf32>
      %23 = vector.broadcast %22 : vector<1x64xf32> to vector<16x64xf32>
      %24 = arith.addf %21, %23 : vector<16x64xf32>
      %c0_23 = arith.constant 0 : index
      %c0_24 = arith.constant 0 : index
      %25 = vector.load %arg5[%c0_23, %c0_24] : memref<16x64xf32, #tpu.memory_space<vmem>>, vector<16x64xf32>
      %26 = arith.addf %24, %25 : vector<16x64xf32>
      %c0_25 = arith.constant 0 : index
      %c0_26 = arith.constant 0 : index
      %27 = vector.load %arg13[%c0_25, %c0_26] : memref<16x64xf32, #tpu.memory_space<vmem>>, vector<16x64xf32>
      tpu.vector_store %arg13[%c0_25, %c0_26], %26 {strides = array<i32>} : memref<16x64xf32, #tpu.memory_space<vmem>>, vector<16x64xf32>,
      %cst_27 = arith.constant dense<0.000000e+00> : vector<16xf32>
      %28 = vector.multi_reduction <add>, %26, %cst_27 [1] : vector<16x64xf32> to vector<16xf32>
      %29 = vector.shape_cast %28 : vector<16xf32> to vector<16x1xf32>
      %cst_28 = arith.constant 6.400000e+01 : f32
      %30 = vector.broadcast %cst_28 : f32 to vector<16x1xf32>
      %31 = arith.divf %29, %30 : vector<16x1xf32>
      %32 = vector.broadcast %31 : vector<16x1xf32> to vector<16x64xf32>
      %33 = arith.subf %26, %32 : vector<16x64xf32>
      %34 = arith.mulf %33, %33 : vector<16x64xf32>
      %cst_29 = arith.constant dense<0.000000e+00> : vector<16xf32>
      %35 = vector.multi_reduction <add>, %34, %cst_29 [1] : vector<16x64xf32> to vector<16xf32>
      %36 = vector.shape_cast %35 : vector<16xf32> to vector<16x1xf32>
      %cst_30 = arith.constant 6.400000e+01 : f32
      %37 = vector.broadcast %cst_30 : f32 to vector<16x1xf32>
      %38 = arith.divf %36, %37 : vector<16x1xf32>
      %39 = vector.broadcast %31 : vector<16x1xf32> to vector<16x64xf32>
      %40 = arith.subf %26, %39 : vector<16x64xf32>
      %cst_31 = arith.constant 9.99999974E-6 : f32
      %41 = vector.broadcast %cst_31 : f32 to vector<16x1xf32>
      %42 = arith.addf %38, %41 : vector<16x1xf32>
      %43 = math.rsqrt %42 : vector<16x1xf32>
      %44 = vector.broadcast %43 : vector<16x1xf32> to vector<16x64xf32>
      %45 = arith.mulf %40, %44 : vector<16x64xf32>
      %c0_32 = arith.constant 0 : index
      %c0_33 = arith.constant 0 : index
      %46 = vector.load %arg6[%c0_32, %c0_33] : memref<1x64xf32, #tpu.memory_space<vmem>>, vector<1x64xf32>
      %47 = vector.broadcast %46 : vector<1x64xf32> to vector<16x64xf32>
      %48 = arith.mulf %45, %47 : vector<16x64xf32>
      %c0_34 = arith.constant 0 : index
      %c0_35 = arith.constant 0 : index
      %49 = vector.load %arg7[%c0_34, %c0_35] : memref<1x64xf32, #tpu.memory_space<vmem>>, vector<1x64xf32>
      %50 = vector.broadcast %49 : vector<1x64xf32> to vector<16x64xf32>
      %51 = arith.addf %48, %50 : vector<16x64xf32>
      %c0_36 = arith.constant 0 : index
      %c0_37 = arith.constant 0 : index
      %52 = vector.load %arg14[%c0_36, %c0_37] : memref<16x64xf32, #tpu.memory_space<vmem>>, vector<16x64xf32>
      tpu.vector_store %arg14[%c0_36, %c0_37], %51 {strides = array<i32>} : memref<16x64xf32, #tpu.memory_space<vmem>>, vector<16x64xf32>,
      %cst_38 = arith.constant 0.000000e+00 : f32
      %53 = vector.broadcast %cst_38 : f32 to vector<16x64xf32>
      %c0_39 = arith.constant 0 : index
      %c0_40 = arith.constant 0 : index
      %54 = vector.load %arg15[%c0_39, %c0_40] : memref<16x64xf32, #tpu.memory_space<vmem>>, vector<16x64xf32>
      tpu.vector_store %arg15[%c0_39, %c0_40], %53 {strides = array<i32>} : memref<16x64xf32, #tpu.memory_space<vmem>>, vector<16x64xf32>,
    } else {
    }
    %c0 = arith.constant 0 : index
    %c0_1 = arith.constant 0 : index
    %3 = vector.load %arg14[%c0, %c0_1] : memref<16x64xf32, #tpu.memory_space<vmem>>, vector<16x64xf32>
    %c0_2 = arith.constant 0 : index
    %c0_3 = arith.constant 0 : index
    %4 = vector.load %arg8[%c0_2, %c0_3] : memref<64x128xf32, #tpu.memory_space<vmem>>, vector<64x128xf32>
    %cst = arith.constant dense<0.000000e+00> : vector<16x128xf32>
    %5 = tpu.matmul %3, %4, %cst {dimension_numbers = #tpu.dot_dimension_numbers<[1], [0], [0], [1], [0, 0, 1, 1], [], []>} : vector<16x64xf32>, vector<64x128xf32>, vector<16x128xf32> -> vector<16x128xf32>
    %c0_4 = arith.constant 0 : index
    %c0_5 = arith.constant 0 : index
    %6 = vector.load %arg9[%c0_4, %c0_5] : memref<1x128xf32, #tpu.memory_space<vmem>>, vector<1x128xf32>
    %7 = vector.broadcast %6 : vector<1x128xf32> to vector<16x128xf32>
    %8 = arith.addf %5, %7 : vector<16x128xf32>
    %cst_6 = arith.constant 0.000000e+00 : f32
    %9 = vector.broadcast %cst_6 : f32 to vector<16x128xf32>
    %10 = arith.maximumf %8, %9 : vector<16x128xf32>
    %c0_7 = arith.constant 0 : index
    %c0_8 = arith.constant 0 : index
    %11 = vector.load %arg15[%c0_7, %c0_8] : memref<16x64xf32, #tpu.memory_space<vmem>>, vector<16x64xf32>
    %c0_9 = arith.constant 0 : index
    %c0_10 = arith.constant 0 : index
    %12 = vector.load %arg10[%c0_9, %c0_10] : memref<128x64xf32, #tpu.memory_space<vmem>>, vector<128x64xf32>
    %cst_11 = arith.constant dense<0.000000e+00> : vector<16x64xf32>
    %13 = tpu.matmul %10, %12, %cst_11 {dimension_numbers = #tpu.dot_dimension_numbers<[1], [0], [0], [1], [0, 0, 1, 1], [], []>} : vector<16x128xf32>, vector<128x64xf32>, vector<16x64xf32> -> vector<16x64xf32>
    %14 = arith.addf %11, %13 : vector<16x64xf32>
    %c0_12 = arith.constant 0 : index
    %c0_13 = arith.constant 0 : index
    %15 = vector.load %arg15[%c0_12, %c0_13] : memref<16x64xf32, #tpu.memory_space<vmem>>, vector<16x64xf32>
    tpu.vector_store %arg15[%c0_12, %c0_13], %14 {strides = array<i32>} : memref<16x64xf32, #tpu.memory_space<vmem>>, vector<16x64xf32>,
    %c0_i32_14 = arith.constant 0 : i32
    %16 = arith.cmpi eq, %arg1, %c0_i32_14 : i32
    %17 = arith.extui %16 : i1 to i32
    %c0_i32_15 = arith.constant 0 : i32
    %18 = arith.cmpi ne, %17, %c0_i32_15 : i32
    scf.if %18 {
      %c0_16 = arith.constant 0 : index
      %c0_17 = arith.constant 0 : index
      %19 = vector.load %arg13[%c0_16, %c0_17] : memref<16x64xf32, #tpu.memory_space<vmem>>, vector<16x64xf32>
      %c0_18 = arith.constant 0 : index
      %c0_19 = arith.constant 0 : index
      %20 = vector.load %arg15[%c0_18, %c0_19] : memref<16x64xf32, #tpu.memory_space<vmem>>, vector<16x64xf32>
      %21 = arith.addf %19, %20 : vector<16x64xf32>
      %c0_20 = arith.constant 0 : index
      %c0_21 = arith.constant 0 : index
      %22 = vector.load %arg11[%c0_20, %c0_21] : memref<1x64xf32, #tpu.memory_space<vmem>>, vector<1x64xf32>
      %23 = vector.broadcast %22 : vector<1x64xf32> to vector<16x64xf32>
      %24 = arith.addf %21, %23 : vector<16x64xf32>
      %c0_22 = arith.constant 0 : index
      %c0_23 = arith.constant 0 : index
      %25 = vector.load %arg12[%c0_22, %c0_23] : memref<16x64xf32, #tpu.memory_space<vmem>>, vector<16x64xf32>
      tpu.vector_store %arg12[%c0_22, %c0_23], %24 {strides = array<i32>} : memref<16x64xf32, #tpu.memory_space<vmem>>, vector<16x64xf32>,
    } else {
    }
    return
  }
  func.func @transform_0(%arg0: i32, %arg1: i32) -> (i32, i32) {
    %c0_i32 = arith.constant 0 : i32
    %c0_i32_0 = arith.constant 0 : i32
    return %arg0, %c0_i32 : i32, i32
  }
  func.func @transform_1(%arg0: i32, %arg1: i32) -> (i32, i32) {
    %c0_i32 = arith.constant 0 : i32
    %c0_i32_0 = arith.constant 0 : i32
    %c0_i32_1 = arith.constant 0 : i32
    return %c0_i32, %c0_i32_0 : i32, i32
  }
  func.func @transform_2(%arg0: i32, %arg1: i32) -> (i32, i32) {
    %c0_i32 = arith.constant 0 : i32
    %c0_i32_0 = arith.constant 0 : i32
    %c0_i32_1 = arith.constant 0 : i32
    return %c0_i32, %c0_i32_0 : i32, i32
  }
  func.func @transform_3(%arg0: i32, %arg1: i32) -> (i32, i32) {
    %c0_i32 = arith.constant 0 : i32
    %c0_i32_0 = arith.constant 0 : i32
    return %arg0, %c0_i32 : i32, i32
  }
  func.func @transform_4(%arg0: i32, %arg1: i32) -> (i32, i32) {
    %c0_i32 = arith.constant 0 : i32
    %c0_i32_0 = arith.constant 0 : i32
    %c0_i32_1 = arith.constant 0 : i32
    return %c0_i32, %c0_i32_0 : i32, i32
  }
  func.func @transform_5(%arg0: i32, %arg1: i32) -> (i32, i32) {
    %c0_i32 = arith.constant 0 : i32
    %c0_i32_0 = arith.constant 0 : i32
    %c0_i32_1 = arith.constant 0 : i32
    return %c0_i32, %c0_i32_0 : i32, i32
  }
  func.func @transform_6(%arg0: i32, %arg1: i32) -> (i32, i32) {
    %c0_i32 = arith.constant 0 : i32
    %c0_i32_0 = arith.constant 0 : i32
    return %c0_i32, %arg1 : i32, i32
  }
  func.func @transform_7(%arg0: i32, %arg1: i32) -> (i32, i32) {
    %c0_i32 = arith.constant 0 : i32
    %c0_i32_0 = arith.constant 0 : i32
    return %c0_i32, %arg1 : i32, i32
  }
  func.func @transform_8(%arg0: i32, %arg1: i32) -> (i32, i32) {
    %c0_i32 = arith.constant 0 : i32
    %c0_i32_0 = arith.constant 0 : i32
    return %arg1, %c0_i32 : i32, i32
  }
  func.func @transform_9(%arg0: i32, %arg1: i32) -> (i32, i32) {
    %c0_i32 = arith.constant 0 : i32
    %c0_i32_0 = arith.constant 0 : i32
    %c0_i32_1 = arith.constant 0 : i32
    return %c0_i32, %c0_i32_0 : i32, i32
  }
  func.func @transform_10(%arg0: i32, %arg1: i32) -> (i32, i32) {
    %c0_i32 = arith.constant 0 : i32
    %c0_i32_0 = arith.constant 0 : i32
    return %arg0, %c0_i32 : i32, i32
  }
}

module attributes {stable_mosaic.version = 11 : i64} {
  func.func @_matmul_bias_kernel(%arg0: i32, %arg1: i32, %arg2: memref<16x64xf32, #tpu.memory_space<vmem>>, %arg3: memref<64x512xf32, #tpu.memory_space<vmem>>, %arg4: memref<1x512xf32, #tpu.memory_space<vmem>>, %arg5: memref<16x512xf32, #tpu.memory_space<vmem>>) attributes {dimension_semantics = [#tpu.dimension_semantics<parallel>, #tpu.dimension_semantics<parallel>], iteration_bounds = array<i64: 1, 1>, scalar_prefetch = 0 : i64, scratch_operands = 0 : i64, tpu.core_type = #tpu.core_type<tc>, window_params = [{transform_indices = @transform_0, window_bounds = array<i64: 16, 64>}, {transform_indices = @transform_1, window_bounds = array<i64: 64, 512>}, {transform_indices = @transform_2, window_bounds = array<i64: 1, 512>}, {transform_indices = @transform_3, window_bounds = array<i64: 16, 512>}]} {
    %c0 = arith.constant 0 : index
    %c0_0 = arith.constant 0 : index
    %0 = vector.load %arg2[%c0, %c0_0] : memref<16x64xf32, #tpu.memory_space<vmem>>, vector<16x64xf32>
    %c0_1 = arith.constant 0 : index
    %c0_2 = arith.constant 0 : index
    %1 = vector.load %arg3[%c0_1, %c0_2] : memref<64x512xf32, #tpu.memory_space<vmem>>, vector<64x512xf32>
    %cst = arith.constant dense<0.000000e+00> : vector<16x512xf32>
    %2 = tpu.matmul %0, %1, %cst {dimension_numbers = #tpu.dot_dimension_numbers<[1], [0], [0], [1], [0, 0, 1, 1], [], []>} : vector<16x64xf32>, vector<64x512xf32>, vector<16x512xf32> -> vector<16x512xf32>
    %c0_3 = arith.constant 0 : index
    %c0_4 = arith.constant 0 : index
    %3 = vector.load %arg4[%c0_3, %c0_4] : memref<1x512xf32, #tpu.memory_space<vmem>>, vector<1x512xf32>
    %4 = vector.broadcast %3 : vector<1x512xf32> to vector<16x512xf32>
    %5 = arith.addf %2, %4 : vector<16x512xf32>
    %c0_5 = arith.constant 0 : index
    %c0_6 = arith.constant 0 : index
    %6 = vector.load %arg5[%c0_5, %c0_6] : memref<16x512xf32, #tpu.memory_space<vmem>>, vector<16x512xf32>
    tpu.vector_store %arg5[%c0_5, %c0_6], %5 {strides = array<i32>} : memref<16x512xf32, #tpu.memory_space<vmem>>, vector<16x512xf32>,
    return
  }
  func.func @transform_0(%arg0: i32, %arg1: i32) -> (i32, i32) {
    %c0_i32 = arith.constant 0 : i32
    %c0_i32_0 = arith.constant 0 : i32
    return %arg0, %c0_i32 : i32, i32
  }
  func.func @transform_1(%arg0: i32, %arg1: i32) -> (i32, i32) {
    %c0_i32 = arith.constant 0 : i32
    %c0_i32_0 = arith.constant 0 : i32
    return %c0_i32, %arg1 : i32, i32
  }
  func.func @transform_2(%arg0: i32, %arg1: i32) -> (i32, i32) {
    %c0_i32 = arith.constant 0 : i32
    %c0_i32_0 = arith.constant 0 : i32
    return %c0_i32, %arg1 : i32, i32
  }
  func.func @transform_3(%arg0: i32, %arg1: i32) -> (i32, i32) {
    %c0_i32 = arith.constant 0 : i32
    return %arg0, %arg1 : i32, i32
  }
}

</mosaic_0001>

<bundles_post_ra>
// kernel: transformer_decoder_forward.4
= control target key start
LH: loop header
LB: loop body
LE: loop exit
PB: predicated region body
PF: predicated region fallthrough
CT: control target
= control target key end

     0   :  { %17 = vsyncpa [#allocation3], 0  ;;  %s716_s0 = inlined_call_operand.vmem [shape: f32[16,64], index: 0, kind: input, shape index: {}]   ;;  %s717_s1 = inlined_call_operand.vmem [shape: f32[1,64], index: 1, kind: input, shape index: {}]   ;;  %s718_s2 = inlined_call_operand.vmem [shape: f32[1,64], index: 2, kind: input, shape index: {}]   ;;  %s719_s3 = inlined_call_operand.vmem [shape: f32[64,64], index: 3, kind: input, shape index: {}]   ;;  %s720_s4 = inlined_call_operand.vmem [shape: f32[1,64], index: 4, kind: input, shape index: {}]   ;;  %s721_s5 = inlined_call_operand.hbm [shape: f32[64,64], index: 5, kind: input, shape index: {}]   ;;  %s722_s6 = inlined_call_operand.vmem [shape: f32[1,64], index: 6, kind: input, shape index: {}]   ;;  %s723_s7 = inlined_call_operand.hbm [shape: f32[64,64], index: 7, kind: input, shape index: {}]   ;;  %s724_s8 = inlined_call_operand.vmem [shape: f32[1,64], index: 8, kind: input, shape index: {}]   ;;  %s725_s9 = inlined_call_operand.vmem [shape: f32[16,64], index: 9, kind: output, shape index: {0}]   ;;  %s726_s10 = inlined_call_operand.vmem [shape: f32[16,64], index: 10, kind: output, shape index: {1}]   ;;  %s727_s11 = inlined_call_operand.vmem [shape: f32[16,64], index: 11, kind: output, shape index: {2}]  }
   0x1   :  { %18 = vsyncpa [#allocation5], 0  ;;  %s557_s17 = smov [#allocation2]  }
   0x2   :  { %s34_s18 = sshll.u32 %s557_s17, 4  ;;  %s35_s18 = int_to_ptr.vmem [resolvable:$true] %s34_s18 }
   0x3   :  { %s521_s19 = scalar_lea.vmem %s35_s18, 1024  ;;  %p526_p1 = scmp.lt.s32.totalorder %s35_s18, %s35_s18 }
   0x4   :  { %p522_p0 = scmp.ne.s32.totalorder %s35_s18, %s521_s19  ;;  %p527_p2 = scmp.lt.s32.totalorder %s521_s19, %s521_s19 }
   0x6   :  { %p528_p3 = por %p527_p2, %p526_p1 }
   0x8   :  { %p529_p4 = pnand %p528_p3, %p522_p0 }
   0xa   :  { %532 = shalt.err (!%p529_p4)
}
   0xb   :  { %s558_s20 = smov 128   ;;  %s559_s21 = smov 8  }
   0xc   :  { %40 = dma.hbm_to_vmem [thread:$0]  %s721_s5, 1024, %s35_s18, [#allocation3], %s558_s20, %s558_s20, %s559_s21  }
   0xd   :  { %s560_s24 = smov [#allocation4]  }
   0xe   :  { %s48_s25 = sshll.u32 %s560_s24, 4  ;;  %s49_s25 = int_to_ptr.vmem [resolvable:$true] %s48_s25 }
   0xf   :  { %s541_s26 = scalar_lea.vmem %s49_s25, 1024  ;;  %p546_p6 = scmp.lt.s32.totalorder %s49_s25, %s49_s25 }
  0x10   :  { %p542_p5 = scmp.ne.s32.totalorder %s49_s25, %s541_s26  ;;  %p547_p7 = scmp.lt.s32.totalorder %s541_s26, %s541_s26 }
  0x12   :  { %p548_p8 = por %p547_p7, %p546_p6 }
  0x14   :  { %p549_p9 = pnand %p548_p8, %p542_p5 }
  0x16   :  { %552 = shalt.err (!%p549_p9)
}
  0x17   :  { %54 = dma.hbm_to_vmem [thread:$0]  %s723_s7, 1024, %s49_s25, [#allocation5], %s558_s20, %s558_s20, %s559_s21  }
  0x18   :  { %553 = dma.done.wait [#allocation3], 1024  }
  0x19   :  { %554 = vsyncadd [#allocation3], 4294966272 }
  0x1a   :  { %555 = dma.done.wait [#allocation5], 1024  }
  0x1b   :  { %556 = vsyncadd [#allocation5], 4294966272  ;;  %vm65_vm0 = vcmask 523264   ;;  %v63_v0 = vld [vmem:[%s716_s0] sm:$0xff]  ;;  %v64_v1 = vld [vmem:[%s716_s0 + $0x8] sm:$0xff] }
  0x1c   :  { %v66_v2 = vsel %vm65_vm0, %v63_v0, 0.0  ;;  %v69_v3 = vsel %vm65_vm0, %v64_v1, 0.0  ;;  %v118_v14 = vld [vmem:[%s719_s3 + $0x38] sm:$0xff]  ;;  %v117_v16 = vld [vmem:[%s719_s3 + $0x30] sm:$0xff]  ;;  %v116_v18 = vld [vmem:[%s719_s3 + $0x28] sm:$0xff] }
  0x1d   :  { %67 = vadd.xlane.f32.xlu0 %v66_v2  ;;  %v216_v15 = vld [vmem:[#allocation2 + $0x38] sm:$0xff]  ;;  %448 = vmatprep.subr.mxu0 %v118_v14  ;;  %v215_v17 = vld [vmem:[#allocation2 + $0x30] sm:$0xff]  ;;  %v214_v19 = vld [vmem:[#allocation2 + $0x28] sm:$0xff] }
  0x1e   :  { %467 = vmatprep.subr.mxu1 %v216_v15  ;;  %449 = vmatpush3.msra.mxu0 %v118_v14  ;;  %v115_v20 = vld [vmem:[%s719_s3 + $0x20] sm:$0xff]  ;;  %v114_v22 = vld [vmem:[%s719_s3 + $0x18] sm:$0xff]  ;;  %v113_v24 = vld [vmem:[%s719_s3 + $0x10] sm:$0xff] }
  0x1f   :  { %468 = vmatpush3.msra.mxu1 %v216_v15  ;;  %450 = vmatprep.subr.mxu0 %v117_v16  ;;  %v213_v21 = vld [vmem:[#allocation2 + $0x20] sm:$0xff]  ;;  %v212_v23 = vld [vmem:[#allocation2 + $0x18] sm:$0xff]  ;;  %v211_v25 = vld [vmem:[#allocation2 + $0x10] sm:$0xff] }
  0x20   :  { %469 = vmatprep.subr.mxu1 %v215_v17  ;;  %451 = vmatpush3.msra.mxu0 %v117_v16  ;;  %v112_v26 = vld [vmem:[%s719_s3 + $0x8] sm:$0xff]  ;;  %v111_v28 = vld [vmem:[%s719_s3] sm:$0xff]  ;;  %v308_v30 = vld [vmem:[#allocation4 + $0x38] sm:$0xff] }
  0x21   :  { %70 = vadd.xlane.f32.xlu0 %v69_v3  ;;  %470 = vmatpush3.msra.mxu1 %v215_v17  ;;  %v210_v27 = vld [vmem:[#allocation2 + $0x8] sm:$0xff]  ;;  %v209_v29 = vld [vmem:[#allocation2] sm:$0xff]  ;;  %v307_v47 = vld [vmem:[#allocation4 + $0x30] sm:$0xff] }
  0x22   :  { %452 = vmatprep.subr.mxu0 %v116_v18  ;;  %471 = vmatprep.subr.mxu1 %v214_v19  ;;  %v407_v38 = vld [vmem:[%s717_s1] ss:$0 sm:$0xff]  ;;  %v306_v48 = vld [vmem:[#allocation4 + $0x28] sm:$0xff]  ;;  %v304_v50 = vld [vmem:[#allocation4 + $0x18] sm:$0xff] }
  0x23   :  { %453 = vmatpush3.msra.mxu0 %v116_v18  ;;  %472 = vmatpush3.msra.mxu1 %v214_v19  ;;  %v408_v40 = vld [vmem:[%s718_s2] ss:$0 sm:$0xff]  ;;  %v303_v51 = vld [vmem:[#allocation4 + $0x10] sm:$0xff]  ;;  %v302_v52 = vld [vmem:[#allocation4 + $0x8] sm:$0xff] }
  0x24   :  { %454 = vmatprep.subr.mxu0 %v115_v20  ;;  %473 = vmatprep.subr.mxu1 %v213_v21  ;;  %v305_v49 = vld [vmem:[#allocation4 + $0x20] sm:$0xff] }
  0x25   :  { %455 = vmatpush3.msra.mxu0 %v115_v20  ;;  %474 = vmatpush3.msra.mxu1 %v213_v21  ;;  %v301_v53 = vld [vmem:[#allocation4] sm:$0xff] }
  0x26   :  { %456 = vmatprep.subr.mxu0 %v114_v22  ;;  %475 = vmatprep.subr.mxu1 %v212_v23  ;;  %v409_v54 = vld [vmem:[%s720_s4] ss:$0 sm:$0xff] }
  0x27   :  { %457 = vmatpush3.msra.mxu0 %v114_v22  ;;  %476 = vmatpush3.msra.mxu1 %v212_v23  ;;  %v412_v55 = vld [vmem:[%s722_s6] ss:$0 sm:$0xff] }
  0x28   :  { %458 = vmatprep.subr.mxu0 %v113_v24  ;;  %477 = vmatprep.subr.mxu1 %v211_v25 }
  0x29   :  { %459 = vmatpush3.msra.mxu0 %v113_v24  ;;  %478 = vmatpush3.msra.mxu1 %v211_v25 }
  0x2a   :  { %460 = vmatprep.subr.mxu0 %v112_v26  ;;  %479 = vmatprep.subr.mxu1 %v210_v27 }
  0x2b   :  { %461 = vmatpush3.msra.mxu0 %v112_v26  ;;  %480 = vmatpush3.msra.mxu1 %v210_v27 }
  0x2c   :  { %462 = vmatprep.subr.mxu0 %v111_v28  ;;  %481 = vmatprep.subr.mxu1 %v209_v29 }
  0x2d   :  { %463 = vmatpush3.msra.mxu0 %v111_v28  ;;  %482 = vmatpush3.msra.mxu1 %v209_v29 }
  0x2e   :  { %486 = vmatprep.subr.mxu0 %v308_v30 }
  0xa6   :  { %v68_v4 = vpop.xlane.xlu0 %67 }
  0xa7   :  { %v73_v5 = vmul.f32 0.015625, %v68_v4 }
  0xa9   :  { %v635_v6 = vsub.f32 %v63_v0, %v73_v5  ;;  %v415_v0 = vld [vmem:[%s724_s8] ss:$0 sm:$0xff] }
  0xaa   :  { %v71_v7 = vpop.xlane.xlu0 %70 }
  0xab   :  { %v74_v8 = vmul.f32 0.015625, %v71_v7  ;;  %v77_v9 = vmul.f32 %v635_v6, %v635_v6 }
  0xad   :  { %v639_v10 = vsub.f32 %v64_v1, %v74_v8  ;;  %v79_v11 = vsel %vm65_vm0, %v77_v9, 0.0 }
  0xae   :  { %80 = vadd.xlane.f32.xlu1 %v79_v11 }
  0xaf   :  { %v78_v12 = vmul.f32 %v639_v10, %v639_v10 }
  0xb1   :  { %v82_v13 = vsel %vm65_vm0, %v78_v12, 0.0 }
  0xb2   :  { %83 = vadd.xlane.f32.xlu1 %v82_v13 }
 0x137   :  { %v81_v31 = vpop.xlane.xlu1 %80 }
 0x138   :  { %v85_v32 = vmul.f32 0.015625, %v81_v31 }
 0x13a   :  { %v87_v33 = vadd.f32 1e-05, %v85_v32 }
 0x13b   :  { %v84_v34 = vpop.xlane.xlu1 %83 }
 0x13c   :  { %509 = vrsqrt.f32 %v87_v33  ;;  %v86_v35 = vmul.f32 0.015625, %v84_v34 }
 0x13e   :  { %v88_v36 = vadd.f32 1e-05, %v86_v35 }
 0x140   :  { %511 = vrsqrt.f32 %v88_v36 }
 0x149   :  { %v510_v37 = vpop.eup %509 }
 0x14a   :  { %v91_v39 = vmul.f32 %v510_v37, %v635_v6 }
 0x14c   :  { %v100_v41 = vmul.f32 %v407_v38, %v91_v39 }
 0x14d   :  { %v512_v42 = vpop.eup %511 }
 0x14e   :  { %v92_v43 = vmul.f32 %v512_v42, %v639_v10  ;;  %v109_v44 = vadd.f32 %v408_v40, %v100_v41 }
 0x150   :  { %v101_v45 = vmul.f32 %v407_v38, %v92_v43  ;;  %464 = vmatprep.mubr.msk.f32.mxu0 %vm65_vm0, %v109_v44  ;;  %483 = vmatprep.mubr.msk.f32.mxu1 %vm65_vm0, %v109_v44 }
 0x152   :  { %v110_v46 = vadd.f32 %v408_v40, %v101_v45 }
 0x154   :  { %465 = vmatmul.mubr.msk.f32.vlgmr.msra.gmra.mxu0 %vm65_vm0, %v110_v46  ;;  %484 = vmatmul.mubr.msk.f32.vlgmr.msra.gmra.mxu1 %vm65_vm0, %v110_v46 }
 0x155   :  { %487 = vmatpush3.msra.mxu0 %v308_v30  ;;  %502 = vmatprep.mubr.msk.f32.mxu0 %vm65_vm0, %v109_v44 }
 0x156   :  { %488 = vmatprep.subr.mxu0 %v307_v47 }
 0x157   :  { %489 = vmatpush3.msra.mxu0 %v307_v47 }
 0x158   :  { %490 = vmatprep.subr.mxu0 %v306_v48 }
 0x159   :  { %491 = vmatpush3.msra.mxu0 %v306_v48 }
 0x15a   :  { %492 = vmatprep.subr.mxu0 %v305_v49 }
 0x15b   :  { %493 = vmatpush3.msra.mxu0 %v305_v49 }
 0x15c   :  { %494 = vmatprep.subr.mxu0 %v304_v50 }
 0x15d   :  { %495 = vmatpush3.msra.mxu0 %v304_v50 }
 0x15e   :  { %496 = vmatprep.subr.mxu0 %v303_v51 }
 0x15f   :  { %497 = vmatpush3.msra.mxu0 %v303_v51 }
 0x160   :  { %498 = vmatprep.subr.mxu0 %v302_v52 }
 0x161   :  { %499 = vmatpush3.msra.mxu0 %v302_v52 }
 0x162   :  { %500 = vmatprep.subr.mxu0 %v301_v53 }
 0x163   :  { %501 = vmatpush3.msra.mxu0 %v301_v53 }
 0x164   :  { %503 = vmatmul.mubr.msk.f32.vlgmr.msra.gmra.mxu0 %vm65_vm0, %v110_v46 }
 0x214   :  { %v466_v56 = vpop.f32.mrf.mxu0  ;;  %v485_v57 = vpop.f32.mrf.mxu1 }
 0x215   :  { %v204_v58 = vadd.f32 %v466_v56, %v409_v54  ;;  %v296_v59 = vadd.f32 %v485_v57, %v412_v55 }
 0x216   :  { %v198_v60 = vpop.f32.mrf.mxu0  ;;  %v290_v61 = vpop.f32.mrf.mxu1 }
 0x217   :  { %208 = vst.msk [vmem:[%s725_s9 + $0x8] sm:$0xff] %vm65_vm0, %v204_v58  ;;  %300 = vst.msk [vmem:[%s726_s10 + $0x8] sm:$0xff] %vm65_vm0, %v296_v59  ;;  %v199_v62 = vadd.f32 %v409_v54, %v198_v60  ;;  %v291_v63 = vadd.f32 %v412_v55, %v290_v61 }
 0x219   :  { %207 = vst.msk [vmem:[%s725_s9] sm:$0xff] %vm65_vm0, %v199_v62  ;;  %299 = vst.msk [vmem:[%s726_s10] sm:$0xff] %vm65_vm0, %v291_v63 }
 0x224   :  { %v504_v1 = vpop.f32.mrf.mxu0 }
 0x225   :  { %v388_v2 = vadd.f32 %v504_v1, %v415_v0 }
 0x226   :  { %v382_v3 = vpop.f32.mrf.mxu0 }
 0x227   :  { %392 = vst.msk [vmem:[%s727_s11 + $0x8] sm:$0xff] %vm65_vm0, %v388_v2  ;;  %v383_v4 = vadd.f32 %v415_v0, %v382_v3 }
 0x229   :  { %391 = vst.msk [vmem:[%s727_s11] sm:$0xff] %vm65_vm0, %v383_v4 }
 0x22a   :  { %405 = vsyncpa [#allocation3], 1 }
 0x22b   :  { %406 = vsyncpa [#allocation5], 1 }

// kernel: transformer_decoder_forward.5
= control target key start
LH: loop header
LB: loop body
LE: loop exit
PB: predicated region body
PF: predicated region fallthrough
CT: control target
= control target key end

     0   :  { %s1188_s12 = smov 0   ;;  %s1190_s13 = smov 0   ;;  %s1299_s0 = inlined_call_operand.vmem [shape: f32[2,8,64], index: 0, kind: input, shape index: {}]   ;;  %s1300_s1 = inlined_call_operand.vmem [shape: f32[2,8,64], index: 1, kind: input, shape index: {}]   ;;  %s1301_s2 = inlined_call_operand.vmem [shape: f32[2,8,64], index: 2, kind: input, shape index: {}]   ;;  %s1302_s3 = inlined_call_operand.vmem [shape: f32[2,8,64], index: 3, kind: output, shape index: {}]  }
   0x1   :  { %s1192_s14 = smov 0  }
   0x2 LB: > { %s25_s15 = sadd.s32 1, %s1154_s13  ;;  %p1013_p0 = scmp.ge.s32.totalorder %s1158_s14, 1  ;;  %s1158_s14 = sphi %s1192_s14, %s13_s14   ;;  %s1154_s13 = sphi %s1190_s13, %s1304_s13   ;;  %s1150_s12 = sphi %s1188_s12, %s1303_s12  }
   0x3   : > { %p27_p1 = scmp.ge.s32.totalorder %s25_s15, 2  ;;  %p173_p2 = scmp.lt.s32.totalorder %s1158_s14, 3 }
   0x5   : > { %s1306_s15 = smov (%p27_p1, %s25_s15), 0  ;;  %p174_p3 = pnand %p1013_p0, %p173_p2 }
   0x6   : > { %p209_p4 = scmp.lt.s32.totalorder (!%p174_p3), %s1150_s12, 1  ;;  %s1162_s23 = smov (!%p174_p3), 112  }
   0x7   : > { %177 = sbr.rel (%p174_p3) target bundleno = 1395 (0x573), region = 32  ;;  %s1163_s24 = smov (!%p174_p3), 96  }
   0x8   : > { %s1164_s25 = smov (!%p174_p3), 80   ;;  %s1165_s5 = smov (!%p174_p3), 16  }
   0x9   : > { %s1166_s6 = smov (!%p174_p3), 32   ;;  %s1167_s7 = smov (!%p174_p3), 48  }
   0xc   : > { %v1160_v0 = vmov 0.0   ;;  %vm1161_vm0 = vmmov 0   ;;  %s1308_s12 = smov (!%p209_p4, %s1150_s12), 1  ;;  %vm234_vm1 = vcmask 130048   ;;  %vm311_vm2 = vcmask 64512  }
   0xd   : > { %1048 = vmatprep.subr.mxu0 %v1160_v0  ;;  %1050 = vmatprep.mubr.msk.f32.mxu0 %vm1161_vm0, %v1160_v0  ;;  %s1212_s16 = sshll.u32 %s1308_s12, 3  ;;  %vm567_vm3 = vcmask 261248   ;;  %vm738_vm4 = vcmask 392448   ;;  %vm909_vm5 = vcmask 523648  }
   0xe   : > { %1053 = vmatprep.subr.mxu1 %v1160_v0  ;;  %1055 = vmatprep.mubr.msk.f32.mxu1 %vm1161_vm0, %v1160_v0  ;;  %s219_s19 = scalar_lea.vmem %s1300_s1, %s1212_s16  ;;  %s215_s22 = scalar_lea.vmem %s1299_s0, %s1212_s16 }
   0xf   : > { %v232_v1 = vld [vmem:[%s219_s19] sm:$0xff]  ;;  %s223_s28 = scalar_lea.vmem %s1301_s2, %s1212_s16  ;;  %s1262_s4 = scalar_lea.vmem %s1302_s3, %s1212_s16 }
  0x10   : > { %1049 = vmatpush3.xpose.msk.msra.mxu0 %vm234_vm1, %v232_v1  ;;  %v231_v2 = vld [vmem:[%s215_s22] sm:$0xff]  ;;  %399 = vrot.lane.b32.xlu1 %v232_v1, %s1162_s23 }
  0x11   : > { %1063 = vmatprep.subr.mxu0 %v1160_v0  ;;  %v1238_v11 = vld [vmem:[%s223_s28] sm:$0xff] }
  0x12   : > { %1054 = vmatpush3.msra.mxu1 %v1238_v11 }
  0x13   : > { %1051 = vmatmul.mubr.msk.f32.vlgmr.msra.gmra.mxu0 %vm234_vm1, %v231_v2  ;;  %1058 = vmatprep.subr.mxu1 %v1160_v0 }
  0x14   : > { %1065 = vmatprep.mubr.msk.f32.mxu0 %vm1161_vm0, %v1160_v0  ;;  %397 = vrot.lane.b32.xlu1 %v231_v2, %s1162_s23 }
  0x18   : > { %569 = vrot.lane.b32.xlu1 %v231_v2, %s1163_s24 }
  0x1c   : > { %742 = vrot.lane.b32.xlu1 %v232_v1, %s1164_s25 }
  0x20   : > { %740 = vrot.lane.b32.xlu1 %v231_v2, %s1164_s25 }
  0x82   : > { %v400_v13 = vpop.permute.xlu1 %399 }
  0x86   : > { %v398_v14 = vpop.permute.xlu1 %397 }
  0x8a   : > { %v570_v16 = vpop.permute.xlu1 %569 }
  0x8e   : > { %v743_v19 = vpop.permute.xlu1 %742 }
  0x92   : > { %v741_v20 = vpop.permute.xlu1 %740 }
  0xd3   : > { %v307_v3 = vpop.f32.mrf.mxu0 }
  0xd4   : > { %v312_v4 = vsel %vm311_vm2, %v307_v3, -inf }
  0xd5   : > { %313 = vmax.xlane.f32.xlu0 %v312_v4  ;;  %v1052_v5 = vpop.f32.mrf.mxu0 }
 0x15e   : > { %v314_v6 = vpop.xlane.xlu0 %313 }
 0x15f   : > { %v315_v7 = vsub.f32 %v307_v3, %v314_v6 }
 0x161   : > { %v316_v8 = vmul.f32 1.442695, %v315_v7 }
 0x163   : > { %1120 = vpow2.f32 %v316_v8 }
 0x170   : > { %v1121_v9 = vpop.eup %1120 }
 0x171   : > { %v318_v10 = vsel %vm311_vm2, %v1121_v9, 0.0 }
 0x172   : > { %319 = vadd.xlane.f32.xlu0 %v318_v10 }
 0x188   : > { %571 = vrot.lane.b32.xlu0 %v232_v1, %s1163_s24 }
 0x1fb   : > { %v320_v12 = vpop.xlane.xlu0 %319 }
 0x1fc   : > { %1122 = vrcp.f32 %v320_v12 }
 0x1ff   : > { %v572_v18 = vpop.permute.xlu0 %571 }
 0x209   : > { %v1123_v15 = vpop.eup %1122 }
 0x20a   : > { %v322_v17 = vmul.f32 %v1123_v15, %v1121_v9 }
 0x20c   : > { %1056 = vmatmul.mubr.msk.f32.vlgmr.msra.gmra.mxu1 %vm311_vm2, %v322_v17 }
 0x20d   : > { %1059 = vmatpush3.xpose.msk.msra.mxu1 %vm234_vm1, %v400_v13  ;;  %1060 = vmatprep.mubr.msk.f32.mxu1 %vm1161_vm0, %v1160_v0 }
 0x20e   : > { %1068 = vmatprep.subr.mxu1 %v1160_v0 }
 0x210   : > { %1061 = vmatmul.mubr.msk.f32.vlgmr.msra.gmra.mxu1 %vm234_vm1, %v398_v14 }
 0x211   : > { %1069 = vmatpush3.xpose.msk.msra.mxu1 %vm234_vm1, %v572_v18  ;;  %1070 = vmatprep.mubr.msk.f32.mxu1 %vm1161_vm0, %v1160_v0 }
 0x212   : > { %1078 = vmatprep.subr.mxu1 %v1160_v0 }
 0x214   : > { %1071 = vmatmul.mubr.msk.f32.vlgmr.msra.gmra.mxu1 %vm234_vm1, %v570_v16 }
 0x215   : > { %1079 = vmatpush3.xpose.msk.msra.mxu1 %vm234_vm1, %v743_v19  ;;  %1080 = vmatprep.mubr.msk.f32.mxu1 %vm1161_vm0, %v1160_v0 }
 0x218   : > { %1081 = vmatmul.mubr.msk.f32.vlgmr.msra.gmra.mxu1 %vm234_vm1, %v741_v20 }
 0x2cc   : > { %v392_v21 = vpop.f32.mrf.mxu1 }
 0x2cd   : > { %396 = vst.msk [vmem:[%s1262_s4] sm:$0xff] %vm234_vm1, %v392_v21 }
 0x2ce   : > { %v1057_v22 = vpop.f32.mrf.mxu1 }
 0x2d0   : > { %v471_v23 = vpop.f32.mrf.mxu1 }
 0x2d1   : > { %v475_v24 = vsel %vm311_vm2, %v471_v23, -inf }
 0x2d2   : > { %476 = vmax.xlane.f32.xlu1 %v475_v24  ;;  %v1062_v25 = vpop.f32.mrf.mxu1 }
 0x2d4   : > { %v643_v26 = vpop.f32.mrf.mxu1 }
 0x2d5   : > { %v647_v27 = vsel %vm311_vm2, %v643_v26, -inf }
 0x2d6   : > { %648 = vmax.xlane.f32.xlu0 %v647_v27  ;;  %v1072_v28 = vpop.f32.mrf.mxu1 }
 0x2d8   : > { %v814_v29 = vpop.f32.mrf.mxu1 }
 0x2d9   : > { %v818_v30 = vsel %vm311_vm2, %v814_v29, -inf }
 0x2da   : > { %819 = vmax.xlane.f32.xlu1 %v818_v30  ;;  %v1082_v31 = vpop.f32.mrf.mxu1 }
 0x35b   : > { %v477_v32 = vpop.xlane.xlu1 %476 }
 0x35c   : > { %v478_v33 = vsub.f32 %v471_v23, %v477_v32 }
 0x35e   : > { %v479_v34 = vmul.f32 1.442695, %v478_v33 }
 0x35f   : > { %v649_v35 = vpop.xlane.xlu0 %648 }
 0x360   : > { %1124 = vpow2.f32 %v479_v34  ;;  %v650_v36 = vsub.f32 %v643_v26, %v649_v35 }
 0x362   : > { %v651_v37 = vmul.f32 1.442695, %v650_v36 }
 0x363   : > { %v820_v42 = vpop.xlane.xlu1 %819 }
 0x364   : > { %1126 = vpow2.f32 %v651_v37  ;;  %v821_v43 = vsub.f32 %v814_v29, %v820_v42 }
 0x366   : > { %v822_v44 = vmul.f32 1.442695, %v821_v43 }
 0x368   : > { %1128 = vpow2.f32 %v822_v44 }
 0x36d   : > { %v1125_v38 = vpop.eup %1124 }
 0x36e   : > { %v481_v39 = vsel %vm311_vm2, %v1125_v38, 0.0 }
 0x36f   : > { %482 = vadd.xlane.f32.xlu1 %v481_v39 }
 0x371   : > { %v1127_v40 = vpop.eup %1126 }
 0x372   : > { %v653_v41 = vsel %vm311_vm2, %v1127_v40, 0.0 }
 0x373   : > { %654 = vadd.xlane.f32.xlu0 %v653_v41 }
 0x375   : > { %v1129_v45 = vpop.eup %1128 }
 0x376   : > { %v824_v46 = vsel %vm311_vm2, %v1129_v45, 0.0 }
 0x380   : > { %658 = vrot.lane.b32.xlu1 %v1238_v11, %s1163_s24 }
 0x389   : > { %487 = vrot.lane.b32.xlu0 %v1238_v11, %s1162_s23 }
 0x3a4   : > { %825 = vadd.xlane.f32.xlu1 %v824_v46 }
 0x3b5   : > { %829 = vrot.lane.b32.xlu1 %v1238_v11, %s1164_s25 }
 0x3f8   : > { %v483_v47 = vpop.xlane.xlu1 %482 }
 0x3f9   : > { %1130 = vrcp.f32 %v483_v47 }
 0x3fc   : > { %v655_v48 = vpop.xlane.xlu0 %654  ;;  %v659_v52 = vpop.permute.xlu1 %658 }
 0x3fd   : > { %1132 = vrcp.f32 %v655_v48 }
 0x400   : > { %v488_v49 = vpop.permute.xlu0 %487 }
 0x401   : > { %1064 = vmatpush3.msra.mxu0 %v488_v49 }
 0x402   : > { %1073 = vmatprep.subr.mxu0 %v1160_v0 }
 0x406   : > { %v1131_v50 = vpop.eup %1130 }
 0x407   : > { %v485_v51 = vmul.f32 %v1131_v50, %v1125_v38 }
 0x409   : > { %1066 = vmatmul.mubr.msk.f32.vlgmr.msra.gmra.mxu0 %vm311_vm2, %v485_v51 }
 0x40a   : > { %v1133_v53 = vpop.eup %1132  ;;  %1074 = vmatpush3.msra.mxu0 %v659_v52  ;;  %1075 = vmatprep.mubr.msk.f32.mxu0 %vm1161_vm0, %v1160_v0 }
 0x40b   : > { %v657_v54 = vmul.f32 %v1133_v53, %v1127_v40  ;;  %1083 = vmatprep.subr.mxu0 %v1160_v0 }
 0x40d   : > { %1076 = vmatmul.mubr.msk.f32.vlgmr.msra.gmra.mxu0 %vm311_vm2, %v657_v54 }
 0x40e   : > { %1085 = vmatprep.mubr.msk.f32.mxu0 %vm1161_vm0, %v1160_v0 }
 0x42d   : > { %v826_v55 = vpop.xlane.xlu1 %825 }
 0x42e   : > { %1134 = vrcp.f32 %v826_v55 }
 0x431   : > { %v830_v56 = vpop.permute.xlu1 %829 }
 0x432   : > { %1084 = vmatpush3.msra.mxu0 %v830_v56 }
 0x43b   : > { %v1135_v57 = vpop.eup %1134 }
 0x43c   : > { %v828_v58 = vmul.f32 %v1135_v57, %v1129_v45 }
 0x43e   : > { %1086 = vmatmul.mubr.msk.f32.vlgmr.msra.gmra.mxu0 %vm311_vm2, %v828_v58 }
 0x4c9   : > { %v559_v59 = vpop.f32.mrf.mxu0 }
 0x4ca   : > { %564 = vrot.lane.b32.xlu0 %v559_v59, %s1165_s5 }
 0x4cb   : > { %v1067_v60 = vpop.f32.mrf.mxu0 }
 0x4cd   : > { %v730_v61 = vpop.f32.mrf.mxu0 }
 0x4ce   : > { %735 = vrot.lane.b32.xlu1 %v730_v61, %s1166_s6 }
 0x4cf   : > { %v1077_v62 = vpop.f32.mrf.mxu0 }
 0x4fe   : > { %v901_v63 = vpop.f32.mrf.mxu0 }
 0x4ff   : > { %906 = vrot.lane.b32.xlu0 %v901_v63, %s1167_s7 }
 0x500   : > { %v1087_v0 = vpop.f32.mrf.mxu0 }
 0x53c   : > { %v565_v1 = vpop.permute.xlu0 %564 }
 0x53d   : > { %568 = vst.msk [vmem:[%s1262_s4] sm:$0xff] %vm567_vm3, %v565_v1 }
 0x540   : > { %v736_v2 = vpop.permute.xlu1 %735 }
 0x541   : > { %739 = vst.msk [vmem:[%s1262_s4] sm:$0xff] %vm738_vm4, %v736_v2 }
 0x571   : > { %v907_v3 = vpop.permute.xlu0 %906 }
 0x572   : > { %910 = vst.msk [vmem:[%s1262_s4] sm:$0xff] %vm909_vm5, %v907_v3 }
 0x573 PF: > { %s13_s14 = sadd.s32 1, %s1158_s14   ;;  %s1303_s12 = smov %s1154_s13 }
 0x574   : > { %p10_p5 = scmp.ge.s32.totalorder %s13_s14, 4   ;;  %s1304_s13 = smov %s1306_s15 }
 0x576   :  { %12 = sbr.rel (!%p10_p5) target bundleno = 2 (0x2), region = 68 }

// kernel: transformer_decoder_forward.7
= control target key start
LH: loop header
LB: loop body
LE: loop exit
PB: predicated region body
PF: predicated region fallthrough
CT: control target
= control target key end

     0   :  { %v248_v3 = vmov 0.0   ;;  %vm70_vm0 = vcmask 523264   ;;  %v50_v35 = vlaneseq  ;;  %s402_s1 = inlined_call_operand.vmem [shape: f32[64,512], index: 1, kind: input, shape index: {}]   ;;  %s403_s0 = inlined_call_operand.vmem [shape: f32[16,64], index: 0, kind: input, shape index: {}]   ;;  %s404_s2 = inlined_call_operand.vmem [shape: f32[1,512], index: 2, kind: input, shape index: {}]   ;;  %s405_s3 = inlined_call_operand.vmem [shape: f32[16,512], index: 3, kind: output, shape index: {}]  }
   0x1   :  { %v45_v0 = vld [vmem:[%s402_s1 + $0xe8] sm:$0xff]  ;;  %v47_v1 = vld [vmem:[%s402_s1 + $0xf8] sm:$0xff]  ;;  %v44_v2 = vld [vmem:[%s402_s1 + $0xe0] sm:$0xff]  ;;  %141 = vmatprep.mubr.f32.mxu0 %v248_v3  ;;  %218 = vmatprep.mubr.f32.mxu1 %v248_v3 }
   0x2   :  { %93 = vmatprep.subr.mxu0 %v45_v0  ;;  %170 = vmatprep.subr.mxu1 %v47_v1  ;;  %v46_v4 = vld [vmem:[%s402_s1 + $0xf0] sm:$0xff]  ;;  %v41_v5 = vld [vmem:[%s402_s1 + $0xc8] sm:$0xff]  ;;  %v43_v6 = vld [vmem:[%s402_s1 + $0xd8] sm:$0xff]  ;;  %v51_v36 = vshrl.u32 %v50_v35, 7 }
   0x3   :  { %94 = vmatpush1.msra.mxu0 %v44_v2  ;;  %171 = vmatpush1.msra.mxu1 %v46_v4  ;;  %v40_v7 = vld [vmem:[%s402_s1 + $0xc0] sm:$0xff]  ;;  %v42_v8 = vld [vmem:[%s402_s1 + $0xd0] sm:$0xff]  ;;  %v37_v9 = vld [vmem:[%s402_s1 + $0xa8] sm:$0xff] }
   0x4   :  { %95 = vmatprep.subr.mxu0 %v41_v5  ;;  %172 = vmatprep.subr.mxu1 %v43_v6  ;;  %v39_v10 = vld [vmem:[%s402_s1 + $0xb8] sm:$0xff]  ;;  %v36_v11 = vld [vmem:[%s402_s1 + $0xa0] sm:$0xff]  ;;  %v38_v12 = vld [vmem:[%s402_s1 + $0xb0] sm:$0xff]  ;;  %v52_v37 = vsub.s32 0, %v51_v36  ;;  %v60_v38 = vsub.s32 2, %v51_v36  ;;  %v56_v40 = vsub.s32 1, %v51_v36 }
   0x5   :  { %96 = vmatpush1.msra.mxu0 %v40_v7  ;;  %173 = vmatpush1.msra.mxu1 %v42_v8  ;;  %v33_v13 = vld [vmem:[%s402_s1 + $0x88] sm:$0xff]  ;;  %v35_v14 = vld [vmem:[%s402_s1 + $0x98] sm:$0xff]  ;;  %v32_v15 = vld [vmem:[%s402_s1 + $0x80] sm:$0xff]  ;;  %v64_v41 = vsub.s32 3, %v51_v36 }
   0x6   :  { %97 = vmatprep.subr.mxu0 %v37_v9  ;;  %174 = vmatprep.subr.mxu1 %v39_v10  ;;  %v34_v16 = vld [vmem:[%s402_s1 + $0x90] sm:$0xff]  ;;  %v29_v17 = vld [vmem:[%s402_s1 + $0x68] sm:$0xff]  ;;  %v31_v18 = vld [vmem:[%s402_s1 + $0x78] sm:$0xff] }
   0x7   :  { %98 = vmatpush1.msra.mxu0 %v36_v11  ;;  %175 = vmatpush1.msra.mxu1 %v38_v12  ;;  %v28_v19 = vld [vmem:[%s402_s1 + $0x60] sm:$0xff]  ;;  %v30_v20 = vld [vmem:[%s402_s1 + $0x70] sm:$0xff]  ;;  %v25_v21 = vld [vmem:[%s402_s1 + $0x48] sm:$0xff] }
   0x8   :  { %99 = vmatprep.subr.mxu0 %v33_v13  ;;  %176 = vmatprep.subr.mxu1 %v35_v14  ;;  %v27_v22 = vld [vmem:[%s402_s1 + $0x58] sm:$0xff]  ;;  %v24_v23 = vld [vmem:[%s402_s1 + $0x40] sm:$0xff]  ;;  %v26_v24 = vld [vmem:[%s402_s1 + $0x50] sm:$0xff] }
   0x9   :  { %100 = vmatpush1.msra.mxu0 %v32_v15  ;;  %177 = vmatpush1.msra.mxu1 %v34_v16  ;;  %v21_v25 = vld [vmem:[%s402_s1 + $0x28] sm:$0xff]  ;;  %v23_v26 = vld [vmem:[%s402_s1 + $0x38] sm:$0xff]  ;;  %v20_v27 = vld [vmem:[%s402_s1 + $0x20] sm:$0xff] }
   0xa   :  { %101 = vmatprep.subr.mxu0 %v29_v17  ;;  %178 = vmatprep.subr.mxu1 %v31_v18  ;;  %v22_v28 = vld [vmem:[%s402_s1 + $0x30] sm:$0xff]  ;;  %v17_v29 = vld [vmem:[%s402_s1 + $0x8] sm:$0xff]  ;;  %v19_v30 = vld [vmem:[%s402_s1 + $0x18] sm:$0xff] }
   0xb   :  { %102 = vmatpush1.msra.mxu0 %v28_v19  ;;  %179 = vmatpush1.msra.mxu1 %v30_v20  ;;  %v16_v31 = vld [vmem:[%s402_s1] sm:$0xff]  ;;  %v18_v32 = vld [vmem:[%s402_s1 + $0x10] sm:$0xff]  ;;  %v15_v34 = vld [vmem:[%s403_s0 + $0x8] sm:$0xff] }
   0xc   :  { %103 = vmatprep.subr.mxu0 %v25_v21  ;;  %180 = vmatprep.subr.mxu1 %v27_v22  ;;  %v14_v33 = vld [vmem:[%s403_s0] sm:$0xff] }
   0xd   :  { %104 = vmatpush1.msra.mxu0 %v24_v23  ;;  %181 = vmatpush1.msra.mxu1 %v26_v24  ;;  %v48_v39 = vld [vmem:[%s404_s2] sm:$0xf] }
   0xe   :  { %105 = vmatprep.subr.mxu0 %v21_v25  ;;  %182 = vmatprep.subr.mxu1 %v23_v26  ;;  %v53_v42 = vrot.slane %v48_v39, %v52_v37  ;;  %v61_v43 = vrot.slane %v48_v39, %v60_v38  ;;  %v57_v44 = vrot.slane %v48_v39, %v56_v40 }
   0xf   :  { %106 = vmatpush1.msra.mxu0 %v20_v27  ;;  %183 = vmatpush1.msra.mxu1 %v22_v28  ;;  %v65_v45 = vrot.slane %v48_v39, %v64_v41 }
  0x10   :  { %107 = vmatprep.subr.mxu0 %v17_v29  ;;  %184 = vmatprep.subr.mxu1 %v19_v30 }
  0x11   :  { %108 = vmatpush1.msra.mxu0 %v16_v31  ;;  %185 = vmatpush1.msra.mxu1 %v18_v32 }
  0x12   :  { %243 = vmatmul.mubr.msk.f32.vlgmr.msra.gmra.mxu0 %vm70_vm0, %v14_v33  ;;  %245 = vmatmul.mubr.msk.f32.vlgmr.msra.gmra.mxu1 %vm70_vm0, %v14_v33 }
  0x13   :  { %147 = vmatprep.mubr.f32.mxu0 %v248_v3  ;;  %224 = vmatprep.mubr.f32.mxu1 %v248_v3 }
  0x16   :  { %244 = vmatmul.mubr.msk.f32.gmra.mxu0 %vm70_vm0, %v15_v34  ;;  %246 = vmatmul.mubr.msk.f32.gmra.mxu1 %vm70_vm0, %v15_v34 }
  0xd2   :  { %v143_v46 = vpop.f32.mrf.mxu0  ;;  %v220_v47 = vpop.f32.mrf.mxu1 }
  0xd3   :  { %v144_v48 = vadd.f32 %v143_v46, %v53_v42  ;;  %v221_v49 = vadd.f32 %v220_v47, %v61_v43 }
  0xd4   :  { %v145_v50 = vpop.f32.mrf.mxu0  ;;  %v222_v51 = vpop.f32.mrf.mxu1 }
  0xd5   :  { %231 = vst [vmem:[%s405_s3] sm:$0xff] %v144_v48  ;;  %233 = vst [vmem:[%s405_s3 + $0x10] sm:$0xff] %v221_v49  ;;  %v146_v52 = vadd.f32 %v145_v50, %v57_v44  ;;  %v223_v53 = vadd.f32 %v222_v51, %v65_v45 }
  0xd6   :  { %v149_v54 = vpop.f32.mrf.mxu0  ;;  %v226_v55 = vpop.f32.mrf.mxu1 }
  0xd7   :  { %232 = vst [vmem:[%s405_s3 + $0x8] sm:$0xff] %v146_v52  ;;  %234 = vst [vmem:[%s405_s3 + $0x18] sm:$0xff] %v223_v53  ;;  %v150_v56 = vadd.f32 %v149_v54, %v53_v42  ;;  %v227_v57 = vadd.f32 %v226_v55, %v61_v43 }
  0xd8   :  { %v151_v58 = vpop.f32.mrf.mxu0  ;;  %v228_v59 = vpop.f32.mrf.mxu1 }
  0xd9   :  { %235 = vst [vmem:[%s405_s3 + $0x20] sm:$0xff] %v150_v56  ;;  %237 = vst [vmem:[%s405_s3 + $0x30] sm:$0xff] %v227_v57  ;;  %v152_v60 = vadd.f32 %v151_v58, %v57_v44  ;;  %v229_v61 = vadd.f32 %v228_v59, %v65_v45 }
  0xdb   :  { %236 = vst [vmem:[%s405_s3 + $0x28] sm:$0xff] %v152_v60  ;;  %238 = vst [vmem:[%s405_s3 + $0x38] sm:$0xff] %v229_v61 }

// kernel: transformer_decoder_forward.6
= control target key start
LH: loop header
LB: loop body
LE: loop exit
PB: predicated region body
PF: predicated region fallthrough
CT: control target
= control target key end

     0   :  { %vm56_vm0 = vcmask 523264   ;;  %s753_s1 = inlined_call_operand.vmem [shape: f32[64,64], index: 1, kind: input, shape index: {}]   ;;  %s754_s0 = inlined_call_operand.vmem [shape: f32[16,64], index: 0, kind: input, shape index: {}]   ;;  %s755_s2 = inlined_call_operand.vmem [shape: f32[1,64], index: 2, kind: input, shape index: {}]   ;;  %s756_s3 = inlined_call_operand.vmem [shape: f32[16,64], index: 3, kind: input, shape index: {}]   ;;  %s757_s6 = inlined_call_operand.vmem [shape: f32[64,128], index: 6, kind: input, shape index: {}]   ;;  %s758_s8 = inlined_call_operand.vmem [shape: f32[128,64], index: 8, kind: input, shape index: {}]   ;;  %s759_s4 = inlined_call_operand.vmem [shape: f32[1,64], index: 4, kind: input, shape index: {}]   ;;  %s760_s5 = inlined_call_operand.vmem [shape: f32[1,64], index: 5, kind: input, shape index: {}]   ;;  %s761_s7 = inlined_call_operand.vmem [shape: f32[1,128], index: 7, kind: input, shape index: {}]   ;;  %s762_s9 = inlined_call_operand.vmem [shape: f32[1,64], index: 9, kind: input, shape index: {}]   ;;  %s763_s10 = inlined_call_operand.vmem [shape: f32[16,64], index: 10, kind: output, shape index: {}]  }
   0x1   :  { %v48_v0 = vld [vmem:[%s753_s1 + $0x38] sm:$0xff]  ;;  %v47_v1 = vld [vmem:[%s753_s1 + $0x30] sm:$0xff]  ;;  %v46_v2 = vld [vmem:[%s753_s1 + $0x28] sm:$0xff] }
   0x2   :  { %462 = vmatprep.subr.mxu1 %v48_v0  ;;  %v39_v3 = vld [vmem:[%s754_s0] sm:$0xff]  ;;  %v44_v5 = vld [vmem:[%s753_s1 + $0x18] sm:$0xff]  ;;  %v43_v6 = vld [vmem:[%s753_s1 + $0x10] sm:$0xff] }
   0x3   :  { %463 = vmatpush3.msra.mxu1 %v48_v0  ;;  %478 = vmatprep.mubr.msk.f32.mxu1 %vm56_vm0, %v39_v3  ;;  %v45_v4 = vld [vmem:[%s753_s1 + $0x20] sm:$0xff]  ;;  %v42_v7 = vld [vmem:[%s753_s1 + $0x8] sm:$0xff]  ;;  %v202_v31 = vld [vmem:[%s757_s6 + $0x38] sm:$0xff] }
   0x4   :  { %464 = vmatprep.subr.mxu1 %v47_v1  ;;  %v41_v8 = vld [vmem:[%s753_s1] sm:$0xff]  ;;  %v40_v9 = vld [vmem:[%s754_s0 + $0x8] sm:$0xff]  ;;  %v201_v32 = vld [vmem:[%s757_s6 + $0x30] sm:$0xff] }
   0x5   :  { %465 = vmatpush3.msra.mxu1 %v47_v1  ;;  %v415_v10 = vld [vmem:[%s755_s2] ss:$0 sm:$0xff]  ;;  %v139_v12 = vld [vmem:[%s756_s3 + $0x8] sm:$0xff]  ;;  %v198_v35 = vld [vmem:[%s757_s6 + $0x18] sm:$0xff] }
   0x6   :  { %466 = vmatprep.subr.mxu1 %v46_v2  ;;  %v138_v15 = vld [vmem:[%s756_s3] sm:$0xff]  ;;  %v200_v33 = vld [vmem:[%s757_s6 + $0x28] sm:$0xff]  ;;  %v197_v36 = vld [vmem:[%s757_s6 + $0x10] sm:$0xff] }
   0x7   :  { %467 = vmatpush3.msra.mxu1 %v46_v2  ;;  %v199_v34 = vld [vmem:[%s757_s6 + $0x20] sm:$0xff]  ;;  %v196_v37 = vld [vmem:[%s757_s6 + $0x8] sm:$0xff]  ;;  %v311_v39 = vld [vmem:[%s758_s8 + $0x78] sm:$0xff] }
   0x8   :  { %468 = vmatprep.subr.mxu1 %v45_v4  ;;  %v195_v38 = vld [vmem:[%s757_s6] sm:$0xff]  ;;  %v310_v40 = vld [vmem:[%s758_s8 + $0x70] sm:$0xff]  ;;  %500 = vmatprep.subr.mxu0 %v311_v39  ;;  %v309_v41 = vld [vmem:[%s758_s8 + $0x68] sm:$0xff] }
   0x9   :  { %469 = vmatpush3.msra.mxu1 %v45_v4  ;;  %501 = vmatpush3.msra.mxu0 %v311_v39  ;;  %v308_v42 = vld [vmem:[%s758_s8 + $0x60] sm:$0xff]  ;;  %v307_v43 = vld [vmem:[%s758_s8 + $0x58] sm:$0xff]  ;;  %v306_v44 = vld [vmem:[%s758_s8 + $0x50] sm:$0xff] }
   0xa   :  { %470 = vmatprep.subr.mxu1 %v44_v5  ;;  %502 = vmatprep.subr.mxu0 %v310_v40  ;;  %v305_v45 = vld [vmem:[%s758_s8 + $0x48] sm:$0xff]  ;;  %v304_v46 = vld [vmem:[%s758_s8 + $0x40] sm:$0xff]  ;;  %v303_v47 = vld [vmem:[%s758_s8 + $0x38] sm:$0xff] }
   0xb   :  { %471 = vmatpush3.msra.mxu1 %v44_v5  ;;  %503 = vmatpush3.msra.mxu0 %v310_v40  ;;  %v302_v48 = vld [vmem:[%s758_s8 + $0x30] sm:$0xff]  ;;  %v301_v49 = vld [vmem:[%s758_s8 + $0x28] sm:$0xff]  ;;  %v300_v50 = vld [vmem:[%s758_s8 + $0x20] sm:$0xff] }
   0xc   :  { %472 = vmatprep.subr.mxu1 %v43_v6  ;;  %504 = vmatprep.subr.mxu0 %v309_v41  ;;  %v418_v58 = vld [vmem:[%s759_s4] ss:$0 sm:$0xff]  ;;  %v299_v5 = vld [vmem:[%s758_s8 + $0x18] sm:$0xff] }
   0xd   :  { %473 = vmatpush3.msra.mxu1 %v43_v6  ;;  %505 = vmatpush3.msra.mxu0 %v309_v41  ;;  %v419_v60 = vld [vmem:[%s760_s5] ss:$0 sm:$0xff]  ;;  %v298_v6 = vld [vmem:[%s758_s8 + $0x10] sm:$0xff] }
   0xe   :  { %474 = vmatprep.subr.mxu1 %v42_v7  ;;  %506 = vmatprep.subr.mxu0 %v308_v42 }
   0xf   :  { %475 = vmatpush3.msra.mxu1 %v42_v7  ;;  %507 = vmatpush3.msra.mxu0 %v308_v42  ;;  %v297_v7 = vld [vmem:[%s758_s8 + $0x8] sm:$0xff] }
  0x10   :  { %476 = vmatprep.subr.mxu1 %v41_v8  ;;  %508 = vmatprep.subr.mxu0 %v307_v43 }
  0x11   :  { %477 = vmatpush3.msra.mxu1 %v41_v8  ;;  %509 = vmatpush3.msra.mxu0 %v307_v43  ;;  %v296_v8 = vld [vmem:[%s758_s8] sm:$0xff] }
  0x12   :  { %479 = vmatmul.mubr.msk.f32.vlgmr.msra.gmra.mxu1 %vm56_vm0, %v40_v9  ;;  %481 = vmatprep.subr.mxu1 %v202_v31  ;;  %v540_v9 = vmov 0.0  }
  0x13   :  { %482 = vmatpush3.msra.mxu1 %v202_v31  ;;  %510 = vmatprep.subr.mxu0 %v306_v44  ;;  %192 = vst.msk [vmem:[#allocation4 + $0x8] sm:$0xff] %vm56_vm0, %v540_v9  ;;  %191 = vst.msk [vmem:[#allocation4] sm:$0xff] %vm56_vm0, %v540_v9 }
  0x14   :  { %483 = vmatprep.subr.mxu1 %v201_v32  ;;  %511 = vmatpush3.msra.mxu0 %v306_v44 }
  0x15   :  { %484 = vmatpush3.msra.mxu1 %v201_v32  ;;  %512 = vmatprep.subr.mxu0 %v305_v45 }
  0x16   :  { %485 = vmatprep.subr.mxu1 %v200_v33  ;;  %513 = vmatpush3.msra.mxu0 %v305_v45 }
  0x17   :  { %486 = vmatpush3.msra.mxu1 %v200_v33  ;;  %514 = vmatprep.subr.mxu0 %v304_v46 }
  0x18   :  { %487 = vmatprep.subr.mxu1 %v199_v34  ;;  %515 = vmatpush3.msra.mxu0 %v304_v46 }
  0x19   :  { %488 = vmatpush3.msra.mxu1 %v199_v34  ;;  %516 = vmatprep.subr.mxu0 %v303_v47 }
  0x1a   :  { %489 = vmatprep.subr.mxu1 %v198_v35  ;;  %517 = vmatpush3.msra.mxu0 %v303_v47 }
  0x1b   :  { %490 = vmatpush3.msra.mxu1 %v198_v35  ;;  %518 = vmatprep.subr.mxu0 %v302_v48 }
  0x1c   :  { %491 = vmatprep.subr.mxu1 %v197_v36  ;;  %519 = vmatpush3.msra.mxu0 %v302_v48 }
  0x1d   :  { %492 = vmatpush3.msra.mxu1 %v197_v36  ;;  %520 = vmatprep.subr.mxu0 %v301_v49 }
  0x1e   :  { %493 = vmatprep.subr.mxu1 %v196_v37  ;;  %521 = vmatpush3.msra.mxu0 %v301_v49 }
  0x1f   :  { %494 = vmatpush3.msra.mxu1 %v196_v37  ;;  %522 = vmatprep.subr.mxu0 %v300_v50 }
  0x20   :  { %495 = vmatprep.subr.mxu1 %v195_v38  ;;  %523 = vmatpush3.msra.mxu0 %v300_v50 }
  0x21   :  { %496 = vmatpush3.msra.mxu1 %v195_v38  ;;  %524 = vmatprep.subr.mxu0 %v299_v5 }
  0x22   :  { %525 = vmatpush3.msra.mxu0 %v299_v5 }
  0x23   :  { %526 = vmatprep.subr.mxu0 %v298_v6 }
  0x24   :  { %527 = vmatpush3.msra.mxu0 %v298_v6 }
  0x25   :  { %528 = vmatprep.subr.mxu0 %v297_v7 }
  0x26   :  { %529 = vmatpush3.msra.mxu0 %v297_v7 }
  0x27   :  { %530 = vmatprep.subr.mxu0 %v296_v8 }
  0x28   :  { %531 = vmatpush3.msra.mxu0 %v296_v8 }
  0xd2   :  { %v480_v11 = vpop.f32.mrf.mxu1 }
  0xd3   :  { %v135_v13 = vadd.f32 %v480_v11, %v415_v10 }
  0xd4   :  { %v129_v14 = vpop.f32.mrf.mxu1 }
  0xd5   :  { %v141_v16 = vadd.f32 %v139_v12, %v135_v13  ;;  %v130_v17 = vadd.f32 %v415_v10, %v129_v14  ;;  %v420_v10 = vld [vmem:[%s761_s7] ss:$0 sm:$0xff] }
  0xd7   :  { %143 = vst.msk [vmem:[#allocation2 + $0x8] sm:$0xff] %vm56_vm0, %v141_v16  ;;  %v140_v18 = vadd.f32 %v138_v15, %v130_v17  ;;  %v147_v20 = vsel %vm56_vm0, %v141_v16, 0.0  ;;  %v295_v17 = vld [vmem:[#allocation4 + $0x8] sm:$0xff] }
  0xd9   :  { %142 = vst.msk [vmem:[#allocation2] sm:$0xff] %vm56_vm0, %v140_v18  ;;  %v144_v19 = vsel %vm56_vm0, %v140_v18, 0.0 }
  0xda   :  { %145 = vadd.xlane.f32.xlu0 %v144_v19  ;;  %v294_v19 = vld [vmem:[#allocation4] sm:$0xff] }
  0xde   :  { %148 = vadd.xlane.f32.xlu0 %v147_v20 }
 0x163   :  { %v146_v21 = vpop.xlane.xlu0 %145 }
 0x164   :  { %v151_v22 = vmul.f32 0.015625, %v146_v21 }
 0x166   :  { %v641_v23 = vsub.f32 %v140_v18, %v151_v22 }
 0x167   :  { %v149_v24 = vpop.xlane.xlu0 %148 }
 0x168   :  { %v152_v25 = vmul.f32 0.015625, %v149_v24  ;;  %v155_v26 = vmul.f32 %v641_v23, %v641_v23 }
 0x16a   :  { %v645_v27 = vsub.f32 %v141_v16, %v152_v25  ;;  %v157_v28 = vsel %vm56_vm0, %v155_v26, 0.0  ;;  %v423_v25 = vld [vmem:[%s762_s9] ss:$0 sm:$0xff] }
 0x16b   :  { %158 = vadd.xlane.f32.xlu1 %v157_v28 }
 0x16c   :  { %v156_v29 = vmul.f32 %v645_v27, %v645_v27 }
 0x16e   :  { %v160_v30 = vsel %vm56_vm0, %v156_v29, 0.0 }
 0x16f   :  { %161 = vadd.xlane.f32.xlu1 %v160_v30 }
 0x1f4   :  { %v159_v51 = vpop.xlane.xlu1 %158 }
 0x1f5   :  { %v163_v52 = vmul.f32 0.015625, %v159_v51 }
 0x1f7   :  { %v165_v53 = vadd.f32 1e-05, %v163_v52 }
 0x1f8   :  { %v162_v54 = vpop.xlane.xlu1 %161 }
 0x1f9   :  { %536 = vrsqrt.f32 %v165_v53  ;;  %v164_v55 = vmul.f32 0.015625, %v162_v54 }
 0x1fb   :  { %v166_v56 = vadd.f32 1e-05, %v164_v55 }
 0x1fd   :  { %538 = vrsqrt.f32 %v166_v56 }
 0x206   :  { %v537_v57 = vpop.eup %536 }
 0x207   :  { %v169_v59 = vmul.f32 %v537_v57, %v641_v23  ;;  %v395_v23 = vld [vmem:[#allocation2 + $0x8] sm:$0xff] }
 0x209   :  { %v178_v61 = vmul.f32 %v418_v58, %v169_v59 }
 0x20a   :  { %v539_v62 = vpop.eup %538 }
 0x20b   :  { %v187_v63 = vadd.f32 %v419_v60, %v178_v61  ;;  %v170_v0 = vmul.f32 %v539_v62, %v645_v27  ;;  %v394_v27 = vld [vmem:[#allocation2] sm:$0xff] }
 0x20d   :  { %189 = vst.msk [vmem:[#allocation3] sm:$0xff] %vm56_vm0, %v187_v63  ;;  %v179_v1 = vmul.f32 %v418_v58, %v170_v0 }
 0x20f   :  { %v188_v2 = vadd.f32 %v419_v60, %v179_v1 }
 0x211   :  { %190 = vst.msk [vmem:[#allocation3 + $0x8] sm:$0xff] %vm56_vm0, %v188_v2 }
 0x214   :  { %v193_v3 = vld [vmem:[#allocation3] sm:$0xff] }
 0x215   :  { %497 = vmatprep.mubr.msk.f32.mxu1 %vm56_vm0, %v193_v3 }
 0x218   :  { %v194_v4 = vld [vmem:[#allocation3 + $0x8] sm:$0xff] }
 0x219   :  { %498 = vmatmul.mubr.msk.f32.vlgmr.msra.gmra.mxu1 %vm56_vm0, %v194_v4 }
 0x2d9   :  { %v499_v11 = vpop.f32.mrf.mxu1 }
 0x2da   :  { %v289_v12 = vadd.f32 %v499_v11, %v420_v10 }
 0x2db   :  { %v283_v13 = vpop.f32.mrf.mxu1 }
 0x2dc   :  { %v284_v14 = vadd.f32 %v420_v10, %v283_v13  ;;  %v293_v16 = vmax.f32 %v289_v12, 0.0 }
 0x2de   :  { %v292_v15 = vmax.f32 %v284_v14, 0.0 }
 0x2e0   :  { %532 = vmatprep.mubr.f32.mxu0 %v292_v15 }
 0x2e1   :  { %533 = vmatmul.mubr.f32.vlgmr.msra.gmra.mxu0 %v293_v16 }
 0x3a1   :  { %v534_v18 = vpop.f32.mrf.mxu0 }
 0x3a2   :  { %v388_v20 = vadd.f32 %v534_v18, %v295_v17 }
 0x3a3   :  { %v378_v21 = vpop.f32.mrf.mxu0 }
 0x3a4   :  { %390 = vst.msk [vmem:[#allocation4 + $0x8] sm:$0xff] %vm56_vm0, %v388_v20  ;;  %v387_v22 = vadd.f32 %v378_v21, %v294_v19 }
 0x3a6   :  { %389 = vst.msk [vmem:[#allocation4] sm:$0xff] %vm56_vm0, %v387_v22 }
 0x3ab   :  { %v397_v24 = vld [vmem:[#allocation4 + $0x8] sm:$0xff] }
 0x3ac   :  { %v399_v26 = vadd.f32 %v397_v24, %v395_v23 }
 0x3ad   :  { %v396_v28 = vld [vmem:[#allocation4] sm:$0xff] }
 0x3ae   :  { %v408_v29 = vadd.f32 %v423_v25, %v399_v26  ;;  %v398_v30 = vadd.f32 %v396_v28, %v394_v27 }
 0x3b0   :  { %410 = vst.msk [vmem:[%s763_s10 + $0x8] sm:$0xff] %vm56_vm0, %v408_v29  ;;  %v407_v31 = vadd.f32 %v423_v25, %v398_v30 }
 0x3b2   :  { %409 = vst.msk [vmem:[%s763_s10] sm:$0xff] %vm56_vm0, %v407_v31 }

</bundles_post_ra>
